<compile_context>
chip_gen: v7x
topology: tpu7x:2x2x1
jax: 0.10.0
libtpu: 0.0.40
codegen_flags: <defaults>
</compile_context>

<pallas_src>
import math

import jax
import jax.numpy as jnp
import numpy as np
from jax.experimental import pallas as pl
from jax.experimental.pallas import tpu as pltpu

EMBED_DIM = 32


def _round_up(x, m):
    return ((x + m - 1) // m) * m


# ---------------------------------------------------------------------------
# Fused whole-network kernel factory
# ---------------------------------------------------------------------------
def _make_fused_kernel(cfg):
    F = cfg["F"]            # input frames
    CE = cfg["CE"]          # num_joints_in * EMBED_DIM
    C = cfg["C"]            # conv channels
    fw0 = cfg["fw0"]        # expand conv width
    L1 = cfg["L1"]          # frames after expand conv
    blocks = cfg["blocks"]  # list of (fw, dil, L_in, L_out, pad)
    n_blocks = len(blocks)

    def kernel(*refs):
        it = iter(refs)
        x2_ref = next(it)     # (1, F, 2J)   f32 joint-major (x, y)
        scr_ref = next(it)    # (1, F, J)    f32 confidences
        rep_ref = next(it)    # (J, CE)      f32 0/1 replication matrix
        wemb_ref = next(it)   # (2J, CE)     f32 block-diagonal embed weight
        wexp_ref = next(it)   # (fw0*CE, C)  bf16 expand conv (taps concatenated)
        sexp_ref = next(it)   # (1, C)       f32 folded BN scale
        bexp_ref = next(it)   # (1, C)       f32 folded BN bias
        blk_w = []
        for _ in range(n_blocks):
            blk_w.append(tuple(next(it) for _ in range(6)))   # wd, sd, bd, w1, s1, b1
        wshr_ref = next(it)   # (C, COUT_PAD)   bf16
        bshr_ref = next(it)   # (1, COUT_PAD)   f32
        o_ref = next(it)      # (1, L_last, COUT_PAD) f32
        # scratch (per-batch, reused across grid steps)
        h_emb = next(it)      # (F, CE)          bf16
        xcat0 = next(it)      # (L1, fw0*CE)     bf16
        h1 = next(it)         # (L1, C)          bf16
        blk_scr = []
        for _ in range(n_blocks):
            blk_scr.append((next(it), next(it)))  # (L_out, fw*C), (L_out, C)

        # ---- stage 1: per-joint embed (Linear 2->32 + ReLU) * softmax(conf) ----
        scr = scr_ref[0]                                        # (F, J)
        m = jnp.max(scr, axis=0, keepdims=True)                 # softmax over frames
        e = jnp.exp(scr - m)
        inv = pl.reciprocal(jnp.sum(e, axis=0, keepdims=True), approx=True)
        sm = e * inv                                            # (F, J)
        sm_rep = jnp.dot(sm, rep_ref[...],
                         preferred_element_type=jnp.float32)    # (F, CE) broadcast
        emb = jnp.maximum(
            jnp.dot(x2_ref[0], wemb_ref[...],
                    preferred_element_type=jnp.float32), 0.0)   # (F, CE)
        h_emb[...] = (emb * sm_rep).astype(jnp.bfloat16)

        # ---- stage 2: expand conv (single deep contraction) + BN + ReLU ----
        for k in range(fw0):
            xcat0[:, pl.ds(k * CE, CE)] = h_emb[pl.ds(k, L1), :]
        y = jnp.dot(xcat0[...], wexp_ref[...],
                    preferred_element_type=jnp.float32)
        y = jnp.maximum(y * sexp_ref[...] + bexp_ref[...], 0.0)
        h1[...] = y.astype(jnp.bfloat16)

        # ---- stage 3: residual blocks (dilated conv -> 1x1 conv, fused) ----
        cur = h1
        for bi, (fw, dil, _L_in_b, L_out_b, pad_b) in enumerate(blocks):
            wd_ref, sd_ref, bd_ref, w1_ref, s1_ref, b1_ref = blk_w[bi]
            xcat_ref, hout_ref = blk_scr[bi]
            # stage K dilated taps into one (L_out, K*C) slab
            for k in range(fw):
                xcat_ref[:, pl.ds(k * C, C)] = cur[pl.ds(k * dil, L_out_b), :]
            yd = jnp.dot(xcat_ref[...], wd_ref[...],
                         preferred_element_type=jnp.float32)
            yd = jnp.maximum(yd * sd_ref[...] + bd_ref[...], 0.0)
            y1 = jnp.dot(yd.astype(jnp.bfloat16), w1_ref[...],
                         preferred_element_type=jnp.float32)
            y1 = jnp.maximum(y1 * s1_ref[...] + b1_ref[...], 0.0)
            # residual = window of the block input (no separate DMA)
            res = cur[pl.ds(pad_b, L_out_b), :].astype(jnp.float32)
            hout_ref[...] = (res + y1).astype(jnp.bfloat16)
            cur = hout_ref

        # ---- stage 4: shrink 1x1 conv into lane-dense padded channel slab ----
        o_ref[0] = (jnp.dot(cur[...], wshr_ref[...],
                            preferred_element_type=jnp.float32)
                    + bshr_ref[...]).astype(o_ref.dtype)

    return kernel


# ---------------------------------------------------------------------------
# Model wrapper (parameters + pallas_call plumbing)
# ---------------------------------------------------------------------------
class ConfTemporalModelV1Pallas:
    def __init__(self, num_joints_in, in_features, num_joints_out, filter_widths,
                 channels=128, key=None):
        assert in_features == 3  # 2 coords + 1 confidence
        for fw in filter_widths:
            assert fw % 2 != 0, "Only odd filter widths are supported"
        self.J = num_joints_in
        self.J_out = num_joints_out
        self.filter_widths = list(filter_widths)
        self.channels = channels
        self.pad = [filter_widths[0] // 2]
        self.causal_shift = [0]  # causal=False
        self.dilations = []
        next_dilation = filter_widths[0]
        for i in range(1, len(filter_widths)):
            self.pad.append((filter_widths[i] - 1) * next_dilation // 2)
            self.causal_shift.append(0)
            self.dilations.append(next_dilation)
            next_dilation *= filter_widths[i]
        self.cout = self.J_out * 3
        self.cout_pad = max(128, _round_up(self.cout, 128))
        self.params = self._init_params(
            key if key is not None else jax.random.PRNGKey(0))
        self._fwd_cache = {}

    def receptive_field(self):
        return 1 + 2 * sum(self.pad)

    # ---------------- parameters (inference-folded BN, bf16 matmul weights) ----
    def _init_params(self, key):
        J, C, E = self.J, self.channels, EMBED_DIM
        CE = J * E
        keys = iter(jax.random.split(key, 256))

        def nrm(shape, scale):
            return jax.random.normal(next(keys), shape, jnp.float32) * scale

        def bn_fold(c):
            gamma = 1.0 + nrm((c,), 0.1)
            beta = nrm((c,), 0.1)
            mean = nrm((c,), 0.1)
            var = 1.0 + 0.1 * jnp.abs(jax.random.normal(next(keys), (c,), jnp.float32))
            scale = gamma / jnp.sqrt(var + 1e-5)
            bias = beta - mean * scale
            return scale[None, :], bias[None, :]

        p = {}
        w_emb = nrm((2, E), 0.5)                         # Linear(2, 32, bias=False)
        p["w_emb"] = w_emb
        w_bd = jnp.zeros((2 * J, CE), jnp.float32)       # block-diagonal per joint
        for j in range(J):
            w_bd = w_bd.at[2 * j:2 * j + 2, E * j:E * (j + 1)].set(w_emb)
        p["w_emb_bd"] = w_bd
        # 0/1 matrix broadcasting per-joint confidence to its 32 embed channels
        p["rep"] = jnp.asarray(
            ((np.arange(CE)[None, :] // E) == np.arange(J)[:, None]).astype(np.float32))

        fw0 = self.filter_widths[0]
        w_expand = nrm((fw0, CE, C), 1.0 / math.sqrt(CE * fw0))
        p["w_expand"] = w_expand
        p["w_expand_cat"] = w_expand.reshape(fw0 * CE, C).astype(jnp.bfloat16)
        p["bn_exp_scale"], p["bn_exp_bias"] = bn_fold(C)

        p["w_conv"], p["w_conv_cat"] = [], []
        p["bn_scale"], p["bn_bias"] = [], []
        for i in range(1, len(self.filter_widths)):
            fw = self.filter_widths[i]
            wd = nrm((fw, C, C), 1.0 / math.sqrt(C * fw))
            p["w_conv"].append(wd)
            p["w_conv_cat"].append(wd.reshape(fw * C, C).astype(jnp.bfloat16))
            s, b = bn_fold(C)
            p["bn_scale"].append(s); p["bn_bias"].append(b)
            w1 = nrm((1, C, C), 1.0 / math.sqrt(C))
            p["w_conv"].append(w1)
            p["w_conv_cat"].append(w1.reshape(C, C).astype(jnp.bfloat16))
            s, b = bn_fold(C)
            p["bn_scale"].append(s); p["bn_bias"].append(b)

        w_shr = nrm((C, self.cout), 1.0 / math.sqrt(C))
        b_shr = nrm((self.cout,), 0.1)
        p["w_shrink"] = w_shr
        p["b_shrink"] = b_shr
        p["w_shrink_pad"] = (jnp.zeros((C, self.cout_pad), jnp.float32)
                             .at[:, :self.cout].set(w_shr).astype(jnp.bfloat16))
        p["b_shrink_pad"] = (jnp.zeros((1, self.cout_pad), jnp.float32)
                             .at[0, :self.cout].set(b_shr))
        return p

    # ---------------- pallas_call construction (cached per (B, F)) -------------
    def _build_call(self, B, F):
        J, C, E = self.J, self.channels, EMBED_DIM
        CE = J * E
        fw0 = self.filter_widths[0]
        L1 = F - (fw0 - 1)
        blocks = []
        L = L1
        for i in range(len(self.pad) - 1):
            fw = self.filter_widths[i + 1]
            dil = self.dilations[i]
            L_out = L - (fw - 1) * dil
            blocks.append((fw, dil, L, L_out, self.pad[i + 1]))
            L = L_out
        L_last = L
        assert L_last >= 1, "sequence shorter than receptive field"
        cfg = dict(F=F, CE=CE, C=C, fw0=fw0, L1=L1, blocks=blocks)
        kernel = _make_fused_kernel(cfg)

        cout_pad = self.cout_pad
        in_specs = [
            pl.BlockSpec((1, F, 2 * J), lambda b: (b, 0, 0)),
            pl.BlockSpec((1, F, J), lambda b: (b, 0, 0)),
            pl.BlockSpec((J, CE), lambda b: (0, 0)),
            pl.BlockSpec((2 * J, CE), lambda b: (0, 0)),
            pl.BlockSpec((fw0 * CE, C), lambda b: (0, 0)),
            pl.BlockSpec((1, C), lambda b: (0, 0)),
            pl.BlockSpec((1, C), lambda b: (0, 0)),
        ]
        for (fw, _dil, _Li, _Lo, _pd) in blocks:
            in_specs += [
                pl.BlockSpec((fw * C, C), lambda b: (0, 0)),
                pl.BlockSpec((1, C), lambda b: (0, 0)),
                pl.BlockSpec((1, C), lambda b: (0, 0)),
                pl.BlockSpec((C, C), lambda b: (0, 0)),
                pl.BlockSpec((1, C), lambda b: (0, 0)),
                pl.BlockSpec((1, C), lambda b: (0, 0)),
            ]
        in_specs += [
            pl.BlockSpec((C, cout_pad), lambda b: (0, 0)),
            pl.BlockSpec((1, cout_pad), lambda b: (0, 0)),
        ]
        out_specs = pl.BlockSpec((1, L_last, cout_pad), lambda b: (b, 0, 0))

        scratch = [
            pltpu.VMEM((F, CE), jnp.bfloat16),
            pltpu.VMEM((L1, fw0 * CE), jnp.bfloat16),
            pltpu.VMEM((L1, C), jnp.bfloat16),
        ]
        for (fw, _dil, _Li, L_out_b, _pd) in blocks:
            scratch += [
                pltpu.VMEM((L_out_b, fw * C), jnp.bfloat16),
                pltpu.VMEM((L_out_b, C), jnp.bfloat16),
            ]

        call = pl.pallas_call(
            kernel,
            out_shape=jax.ShapeDtypeStruct((B, L_last, cout_pad), jnp.float32),
            grid=(B,),
            in_specs=in_specs,
            out_specs=out_specs,
            scratch_shapes=scratch,
            compiler_params=pltpu.CompilerParams(
                dimension_semantics=("parallel",),   # batch shards across TCs (v7x)
                vmem_limit_bytes=64 * 1024 * 1024,
            ),
        )
        return call, L_last

    def __call__(self, x):
        # x: (B, F, J, 3) = (batch, frames, joints, [x, y, confidence])
        B, F, J, Cf = x.shape
        assert J == self.J and Cf == 3
        assert F >= self.receptive_field()
        p = self.params

        scr = x[..., 2]                                 # (B, F, J) confidences
        x2 = x[..., :2].reshape(B, F, 2 * J)            # joint-major coords

        key = (B, F)
        if key not in self._fwd_cache:
            self._fwd_cache[key] = self._build_call(B, F)
        call, L_last = self._fwd_cache[key]

        args = [x2, scr, p["rep"], p["w_emb_bd"], p["w_expand_cat"],
                p["bn_exp_scale"], p["bn_exp_bias"]]
        for i in range(len(self.pad) - 1):
            args += [p["w_conv_cat"][2 * i], p["bn_scale"][2 * i], p["bn_bias"][2 * i],
                     p["w_conv_cat"][2 * i + 1], p["bn_scale"][2 * i + 1],
                     p["bn_bias"][2 * i + 1]]
        args += [p["w_shrink_pad"], p["b_shrink_pad"]]

        y = call(*args)                                 # (B, L_last, cout_pad)
        y = y[..., :self.cout]                          # drop lane padding
        return y.reshape(B, L_last, self.J_out, 3)


# ---------------------------------------------------------------------------
# Pure-JAX reference (same bf16 weight/activation rounding as the kernel)
# ---------------------------------------------------------------------------
def ref_forward(model, x):
    p = model.params
    B, F, J, _ = x.shape
    E = EMBED_DIM
    scr = jax.nn.softmax(x[..., 2], axis=1)
    emb = jax.nn.relu(jnp.einsum("bfjc,ce->bfje", x[..., :2], p["w_emb"]))
    h = (emb * scr[..., None]).reshape(B, F, J * E).astype(jnp.bfloat16)

    def conv(h, w, dil, scale, bias, relu):
        K = w.shape[0]
        L_out = h.shape[1] - (K - 1) * dil
        out = jnp.zeros((h.shape[0], L_out, w.shape[2]), jnp.float32)
        for k in range(K):
            out = out + jnp.einsum("blc,cd->bld",
                                   h[:, k * dil:k * dil + L_out, :],
                                   w[k].astype(jnp.bfloat16),
                                   preferred_element_type=jnp.float32)
        out = out * scale + bias
        return jnp.maximum(out, 0.0) if relu else out

    h = conv(h, p["w_expand"], 1, p["bn_exp_scale"], p["bn_exp_bias"],
             True).astype(jnp.bfloat16)
    for i in range(len(model.pad) - 1):
        pad = model.pad[i + 1]
        res = h[:, pad: h.shape[1] - pad, :].astype(jnp.float32)
        hd = conv(h, p["w_conv"][2 * i], model.dilations[i],
                  p["bn_scale"][2 * i], p["bn_bias"][2 * i], True).astype(jnp.bfloat16)
        h1 = conv(hd, p["w_conv"][2 * i + 1], 1,
                  p["bn_scale"][2 * i + 1], p["bn_bias"][2 * i + 1], True)
        h = (res + h1).astype(jnp.bfloat16)
    y = jnp.einsum("blc,cd->bld", h, p["w_shrink"].astype(jnp.bfloat16),
                   preferred_element_type=jnp.float32) + p["b_shrink"][None, None, :]
    return y.reshape(B, -1, model.J_out, 3)


if __name__ == "__main__":
    key = jax.random.PRNGKey(0)
    k_x, k_p = jax.random.split(key)

    B, F, J, J_OUT = 2, 32, 4, 4
    model = ConfTemporalModelV1Pallas(
        num_joints_in=J, in_features=3, num_joints_out=J_OUT,
        filter_widths=[3, 3, 3], channels=128, key=k_p)

    x = jax.random.normal(k_x, (B, F, J, 3), jnp.float32)

    out = jax.block_until_ready(model(x))
    out_frames = F - (model.receptive_field() - 1)
    assert out.shape == (B, out_frames, J_OUT, 3), out.shape

    ref = ref_forward(model, x)
    np.testing.assert_allclose(np.asarray(out), np.asarray(ref), rtol=5e-2, atol=5e-2)

    print("KERNEL_OK")
</pallas_src>

<mosaic_0001>
module attributes {stable_mosaic.version = 11 : i64} {
  func.func @kernel(%arg0: i32, %arg1: memref<1x32x8xf32, #tpu.memory_space<vmem>>, %arg2: memref<1x32x4xf32, #tpu.memory_space<vmem>>, %arg3: memref<4x128xf32, #tpu.memory_space<vmem>>, %arg4: memref<8x128xf32, #tpu.memory_space<vmem>>, %arg5: memref<384x128xbf16, #tpu.memory_space<vmem>>, %arg6: memref<1x128xf32, #tpu.memory_space<vmem>>, %arg7: memref<1x128xf32, #tpu.memory_space<vmem>>, %arg8: memref<384x128xbf16, #tpu.memory_space<vmem>>, %arg9: memref<1x128xf32, #tpu.memory_space<vmem>>, %arg10: memref<1x128xf32, #tpu.memory_space<vmem>>, %arg11: memref<128x128xbf16, #tpu.memory_space<vmem>>, %arg12: memref<1x128xf32, #tpu.memory_space<vmem>>, %arg13: memref<1x128xf32, #tpu.memory_space<vmem>>, %arg14: memref<384x128xbf16, #tpu.memory_space<vmem>>, %arg15: memref<1x128xf32, #tpu.memory_space<vmem>>, %arg16: memref<1x128xf32, #tpu.memory_space<vmem>>, %arg17: memref<128x128xbf16, #tpu.memory_space<vmem>>, %arg18: memref<1x128xf32, #tpu.memory_space<vmem>>, %arg19: memref<1x128xf32, #tpu.memory_space<vmem>>, %arg20: memref<128x128xbf16, #tpu.memory_space<vmem>>, %arg21: memref<1x128xf32, #tpu.memory_space<vmem>>, %arg22: memref<1x6x128xf32, #tpu.memory_space<vmem>>, %arg23: memref<32x128xbf16, #tpu.memory_space<vmem>>, %arg24: memref<30x384xbf16, #tpu.memory_space<vmem>>, %arg25: memref<30x128xbf16, #tpu.memory_space<vmem>>, %arg26: memref<24x384xbf16, #tpu.memory_space<vmem>>, %arg27: memref<24x128xbf16, #tpu.memory_space<vmem>>, %arg28: memref<6x384xbf16, #tpu.memory_space<vmem>>, %arg29: memref<6x128xbf16, #tpu.memory_space<vmem>>) attributes {dimension_semantics = [#tpu.dimension_semantics<parallel>], iteration_bounds = array<i64: 2>, scalar_prefetch = 0 : i64, scratch_operands = 7 : i64, tpu.core_type = #tpu.core_type<tc>, window_params = [{transform_indices = @transform_0, window_bounds = array<i64: 1, 32, 8>}, {transform_indices = @transform_1, window_bounds = array<i64: 1, 32, 4>}, {pipeline_mode = #tpu.pipeline_mode<synchronous>, transform_indices = @transform_2, window_bounds = array<i64: 4, 128>}, {pipeline_mode = #tpu.pipeline_mode<synchronous>, transform_indices = @transform_3, window_bounds = array<i64: 8, 128>}, {pipeline_mode = #tpu.pipeline_mode<synchronous>, transform_indices = @transform_4, window_bounds = array<i64: 384, 128>}, {pipeline_mode = #tpu.pipeline_mode<synchronous>, transform_indices = @transform_5, window_bounds = array<i64: 1, 128>}, {pipeline_mode = #tpu.pipeline_mode<synchronous>, transform_indices = @transform_6, window_bounds = array<i64: 1, 128>}, {pipeline_mode = #tpu.pipeline_mode<synchronous>, transform_indices = @transform_7, window_bounds = array<i64: 384, 128>}, {pipeline_mode = #tpu.pipeline_mode<synchronous>, transform_indices = @transform_8, window_bounds = array<i64: 1, 128>}, {pipeline_mode = #tpu.pipeline_mode<synchronous>, transform_indices = @transform_9, window_bounds = array<i64: 1, 128>}, {pipeline_mode = #tpu.pipeline_mode<synchronous>, transform_indices = @transform_10, window_bounds = array<i64: 128, 128>}, {pipeline_mode = #tpu.pipeline_mode<synchronous>, transform_indices = @transform_11, window_bounds = array<i64: 1, 128>}, {pipeline_mode = #tpu.pipeline_mode<synchronous>, transform_indices = @transform_12, window_bounds = array<i64: 1, 128>}, {pipeline_mode = #tpu.pipeline_mode<synchronous>, transform_indices = @transform_13, window_bounds = array<i64: 384, 128>}, {pipeline_mode = #tpu.pipeline_mode<synchronous>, transform_indices = @transform_14, window_bounds = array<i64: 1, 128>}, {pipeline_mode = #tpu.pipeline_mode<synchronous>, transform_indices = @transform_15, window_bounds = array<i64: 1, 128>}, {pipeline_mode = #tpu.pipeline_mode<synchronous>, transform_indices = @transform_16, window_bounds = array<i64: 128, 128>}, {pipeline_mode = #tpu.pipeline_mode<synchronous>, transform_indices = @transform_17, window_bounds = array<i64: 1, 128>}, {pipeline_mode = #tpu.pipeline_mode<synchronous>, transform_indices = @transform_18, window_bounds = array<i64: 1, 128>}, {pipeline_mode = #tpu.pipeline_mode<synchronous>, transform_indices = @transform_19, window_bounds = array<i64: 128, 128>}, {pipeline_mode = #tpu.pipeline_mode<synchronous>, transform_indices = @transform_20, window_bounds = array<i64: 1, 128>}, {transform_indices = @transform_21, window_bounds = array<i64: 1, 6, 128>}]} {
    %c0 = arith.constant 0 : index
    %c0_0 = arith.constant 0 : index
    %c0_1 = arith.constant 0 : index
    %0 = vector.load %arg2[%c0, %c0_0, %c0_1] : memref<1x32x4xf32, #tpu.memory_space<vmem>>, vector<1x32x4xf32>
    %1 = vector.shape_cast %0 : vector<1x32x4xf32> to vector<32x4xf32>
    %cst = arith.constant dense<0xFF800000> : vector<4xf32>
    %2 = vector.multi_reduction <maximumf>, %1, %cst [0] : vector<32x4xf32> to vector<4xf32>
    %3 = vector.shape_cast %2 : vector<4xf32> to vector<1x4xf32>
    %4 = vector.broadcast %3 : vector<1x4xf32> to vector<32x4xf32>
    %5 = arith.subf %1, %4 : vector<32x4xf32>
    %6 = math.exp %5 : vector<32x4xf32>
    %cst_2 = arith.constant dense<0.000000e+00> : vector<4xf32>
    %7 = vector.multi_reduction <add>, %6, %cst_2 [0] : vector<32x4xf32> to vector<4xf32>
    %8 = vector.shape_cast %7 : vector<4xf32> to vector<1x4xf32>
    %9 = tpu.reciprocal %8 {approx = true} : vector<1x4xf32> -> vector<1x4xf32>
    %10 = vector.broadcast %9 : vector<1x4xf32> to vector<32x4xf32>
    %11 = arith.mulf %6, %10 : vector<32x4xf32>
    %c0_3 = arith.constant 0 : index
    %c0_4 = arith.constant 0 : index
    %12 = vector.load %arg3[%c0_3, %c0_4] : memref<4x128xf32, #tpu.memory_space<vmem>>, vector<4x128xf32>
    %cst_5 = arith.constant dense<0.000000e+00> : vector<32x128xf32>
    %13 = tpu.matmul %11, %12, %cst_5 {dimension_numbers = #tpu.dot_dimension_numbers<[1], [0], [0], [1], [0, 0, 1, 1], [], []>} : vector<32x4xf32>, vector<4x128xf32>, vector<32x128xf32> -> vector<32x128xf32>
    %c0_6 = arith.constant 0 : index
    %c0_7 = arith.constant 0 : index
    %c0_8 = arith.constant 0 : index
    %14 = vector.load %arg1[%c0_6, %c0_7, %c0_8] : memref<1x32x8xf32, #tpu.memory_space<vmem>>, vector<1x32x8xf32>
    %15 = vector.shape_cast %14 : vector<1x32x8xf32> to vector<32x8xf32>
    %c0_9 = arith.constant 0 : index
    %c0_10 = arith.constant 0 : index
    %16 = vector.load %arg4[%c0_9, %c0_10] : memref<8x128xf32, #tpu.memory_space<vmem>>, vector<8x128xf32>
    %cst_11 = arith.constant dense<0.000000e+00> : vector<32x128xf32>
    %17 = tpu.matmul %15, %16, %cst_11 {dimension_numbers = #tpu.dot_dimension_numbers<[1], [0], [0], [1], [0, 0, 1, 1], [], []>} : vector<32x8xf32>, vector<8x128xf32>, vector<32x128xf32> -> vector<32x128xf32>
    %cst_12 = arith.constant 0.000000e+00 : f32
    %18 = vector.broadcast %cst_12 : f32 to vector<32x128xf32>
    %19 = arith.maximumf %17, %18 : vector<32x128xf32>
    %20 = arith.mulf %19, %13 : vector<32x128xf32>
    %21 = arith.truncf %20 : vector<32x128xf32> to vector<32x128xbf16>
    %c0_13 = arith.constant 0 : index
    %c0_14 = arith.constant 0 : index
    %22 = vector.load %arg23[%c0_13, %c0_14] : memref<32x128xbf16, #tpu.memory_space<vmem>>, vector<32x128xbf16>
    tpu.vector_store %arg23[%c0_13, %c0_14], %21 {strides = array<i32>} : memref<32x128xbf16, #tpu.memory_space<vmem>>, vector<32x128xbf16>,
    %c0_15 = arith.constant 0 : index
    %c0_16 = arith.constant 0 : index
    %23 = vector.load %arg23[%c0_15, %c0_16] : memref<32x128xbf16, #tpu.memory_space<vmem>>, vector<30x128xbf16>
    %c0_17 = arith.constant 0 : index
    %c0_18 = arith.constant 0 : index
    %24 = vector.load %arg24[%c0_17, %c0_18] : memref<30x384xbf16, #tpu.memory_space<vmem>>, vector<30x128xbf16>
    tpu.vector_store %arg24[%c0_17, %c0_18], %23 {strides = array<i32>} : memref<30x384xbf16, #tpu.memory_space<vmem>>, vector<30x128xbf16>,
    %c1 = arith.constant 1 : index
    %c0_19 = arith.constant 0 : index
    %25 = vector.load %arg23[%c1, %c0_19] : memref<32x128xbf16, #tpu.memory_space<vmem>>, vector<30x128xbf16>
    %c0_20 = arith.constant 0 : index
    %c128 = arith.constant 128 : index
    %26 = vector.load %arg24[%c0_20, %c128] : memref<30x384xbf16, #tpu.memory_space<vmem>>, vector<30x128xbf16>
    tpu.vector_store %arg24[%c0_20, %c128], %25 {strides = array<i32>} : memref<30x384xbf16, #tpu.memory_space<vmem>>, vector<30x128xbf16>,
    %c2 = arith.constant 2 : index
    %c0_21 = arith.constant 0 : index
    %27 = vector.load %arg23[%c2, %c0_21] : memref<32x128xbf16, #tpu.memory_space<vmem>>, vector<30x128xbf16>
    %c0_22 = arith.constant 0 : index
    %c256 = arith.constant 256 : index
    %28 = vector.load %arg24[%c0_22, %c256] : memref<30x384xbf16, #tpu.memory_space<vmem>>, vector<30x128xbf16>
    tpu.vector_store %arg24[%c0_22, %c256], %27 {strides = array<i32>} : memref<30x384xbf16, #tpu.memory_space<vmem>>, vector<30x128xbf16>,
    %c0_23 = arith.constant 0 : index
    %c0_24 = arith.constant 0 : index
    %29 = vector.load %arg24[%c0_23, %c0_24] : memref<30x384xbf16, #tpu.memory_space<vmem>>, vector<30x384xbf16>
    %c0_25 = arith.constant 0 : index
    %c0_26 = arith.constant 0 : index
    %30 = vector.load %arg5[%c0_25, %c0_26] : memref<384x128xbf16, #tpu.memory_space<vmem>>, vector<384x128xbf16>
    %cst_27 = arith.constant dense<0.000000e+00> : vector<30x128xf32>
    %31 = tpu.matmul %29, %30, %cst_27 {dimension_numbers = #tpu.dot_dimension_numbers<[1], [0], [0], [1], [0, 0, 1, 1], [], []>} : vector<30x384xbf16>, vector<384x128xbf16>, vector<30x128xf32> -> vector<30x128xf32>
    %c0_28 = arith.constant 0 : index
    %c0_29 = arith.constant 0 : index
    %32 = vector.load %arg6[%c0_28, %c0_29] : memref<1x128xf32, #tpu.memory_space<vmem>>, vector<1x128xf32>
    %33 = vector.broadcast %32 : vector<1x128xf32> to vector<30x128xf32>
    %34 = arith.mulf %31, %33 : vector<30x128xf32>
    %c0_30 = arith.constant 0 : index
    %c0_31 = arith.constant 0 : index
    %35 = vector.load %arg7[%c0_30, %c0_31] : memref<1x128xf32, #tpu.memory_space<vmem>>, vector<1x128xf32>
    %36 = vector.broadcast %35 : vector<1x128xf32> to vector<30x128xf32>
    %37 = arith.addf %34, %36 : vector<30x128xf32>
    %cst_32 = arith.constant 0.000000e+00 : f32
    %38 = vector.broadcast %cst_32 : f32 to vector<30x128xf32>
    %39 = arith.maximumf %37, %38 : vector<30x128xf32>
    %40 = arith.truncf %39 : vector<30x128xf32> to vector<30x128xbf16>
    %c0_33 = arith.constant 0 : index
    %c0_34 = arith.constant 0 : index
    %41 = vector.load %arg25[%c0_33, %c0_34] : memref<30x128xbf16, #tpu.memory_space<vmem>>, vector<30x128xbf16>
    tpu.vector_store %arg25[%c0_33, %c0_34], %40 {strides = array<i32>} : memref<30x128xbf16, #tpu.memory_space<vmem>>, vector<30x128xbf16>,
    %c0_35 = arith.constant 0 : index
    %c0_36 = arith.constant 0 : index
    %42 = vector.load %arg25[%c0_35, %c0_36] : memref<30x128xbf16, #tpu.memory_space<vmem>>, vector<24x128xbf16>
    %c0_37 = arith.constant 0 : index
    %c0_38 = arith.constant 0 : index
    %43 = vector.load %arg26[%c0_37, %c0_38] : memref<24x384xbf16, #tpu.memory_space<vmem>>, vector<24x128xbf16>
    tpu.vector_store %arg26[%c0_37, %c0_38], %42 {strides = array<i32>} : memref<24x384xbf16, #tpu.memory_space<vmem>>, vector<24x128xbf16>,
    %c3 = arith.constant 3 : index
    %c0_39 = arith.constant 0 : index
    %44 = vector.load %arg25[%c3, %c0_39] : memref<30x128xbf16, #tpu.memory_space<vmem>>, vector<24x128xbf16>
    %c0_40 = arith.constant 0 : index
    %c128_41 = arith.constant 128 : index
    %45 = vector.load %arg26[%c0_40, %c128_41] : memref<24x384xbf16, #tpu.memory_space<vmem>>, vector<24x128xbf16>
    tpu.vector_store %arg26[%c0_40, %c128_41], %44 {strides = array<i32>} : memref<24x384xbf16, #tpu.memory_space<vmem>>, vector<24x128xbf16>,
    %c6 = arith.constant 6 : index
    %c0_42 = arith.constant 0 : index
    %46 = vector.load %arg25[%c6, %c0_42] : memref<30x128xbf16, #tpu.memory_space<vmem>>, vector<24x128xbf16>
    %c0_43 = arith.constant 0 : index
    %c256_44 = arith.constant 256 : index
    %47 = vector.load %arg26[%c0_43, %c256_44] : memref<24x384xbf16, #tpu.memory_space<vmem>>, vector<24x128xbf16>
    tpu.vector_store %arg26[%c0_43, %c256_44], %46 {strides = array<i32>} : memref<24x384xbf16, #tpu.memory_space<vmem>>, vector<24x128xbf16>,
    %c0_45 = arith.constant 0 : index
    %c0_46 = arith.constant 0 : index
    %48 = vector.load %arg26[%c0_45, %c0_46] : memref<24x384xbf16, #tpu.memory_space<vmem>>, vector<24x384xbf16>
    %c0_47 = arith.constant 0 : index
    %c0_48 = arith.constant 0 : index
    %49 = vector.load %arg8[%c0_47, %c0_48] : memref<384x128xbf16, #tpu.memory_space<vmem>>, vector<384x128xbf16>
    %cst_49 = arith.constant dense<0.000000e+00> : vector<24x128xf32>
    %50 = tpu.matmul %48, %49, %cst_49 {dimension_numbers = #tpu.dot_dimension_numbers<[1], [0], [0], [1], [0, 0, 1, 1], [], []>} : vector<24x384xbf16>, vector<384x128xbf16>, vector<24x128xf32> -> vector<24x128xf32>
    %c0_50 = arith.constant 0 : index
    %c0_51 = arith.constant 0 : index
    %51 = vector.load %arg9[%c0_50, %c0_51] : memref<1x128xf32, #tpu.memory_space<vmem>>, vector<1x128xf32>
    %52 = vector.broadcast %51 : vector<1x128xf32> to vector<24x128xf32>
    %53 = arith.mulf %50, %52 : vector<24x128xf32>
    %c0_52 = arith.constant 0 : index
    %c0_53 = arith.constant 0 : index
    %54 = vector.load %arg10[%c0_52, %c0_53] : memref<1x128xf32, #tpu.memory_space<vmem>>, vector<1x128xf32>
    %55 = vector.broadcast %54 : vector<1x128xf32> to vector<24x128xf32>
    %56 = arith.addf %53, %55 : vector<24x128xf32>
    %cst_54 = arith.constant 0.000000e+00 : f32
    %57 = vector.broadcast %cst_54 : f32 to vector<24x128xf32>
    %58 = arith.maximumf %56, %57 : vector<24x128xf32>
    %59 = arith.truncf %58 : vector<24x128xf32> to vector<24x128xbf16>
    %c0_55 = arith.constant 0 : index
    %c0_56 = arith.constant 0 : index
    %60 = vector.load %arg11[%c0_55, %c0_56] : memref<128x128xbf16, #tpu.memory_space<vmem>>, vector<128x128xbf16>
    %cst_57 = arith.constant dense<0.000000e+00> : vector<24x128xf32>
    %61 = tpu.matmul %59, %60, %cst_57 {dimension_numbers = #tpu.dot_dimension_numbers<[1], [0], [0], [1], [0, 0, 1, 1], [], []>} : vector<24x128xbf16>, vector<128x128xbf16>, vector<24x128xf32> -> vector<24x128xf32>
    %c0_58 = arith.constant 0 : index
    %c0_59 = arith.constant 0 : index
    %62 = vector.load %arg12[%c0_58, %c0_59] : memref<1x128xf32, #tpu.memory_space<vmem>>, vector<1x128xf32>
    %63 = vector.broadcast %62 : vector<1x128xf32> to vector<24x128xf32>
    %64 = arith.mulf %61, %63 : vector<24x128xf32>
    %c0_60 = arith.constant 0 : index
    %c0_61 = arith.constant 0 : index
    %65 = vector.load %arg13[%c0_60, %c0_61] : memref<1x128xf32, #tpu.memory_space<vmem>>, vector<1x128xf32>
    %66 = vector.broadcast %65 : vector<1x128xf32> to vector<24x128xf32>
    %67 = arith.addf %64, %66 : vector<24x128xf32>
    %cst_62 = arith.constant 0.000000e+00 : f32
    %68 = vector.broadcast %cst_62 : f32 to vector<24x128xf32>
    %69 = arith.maximumf %67, %68 : vector<24x128xf32>
    %c3_63 = arith.constant 3 : index
    %c0_64 = arith.constant 0 : index
    %70 = vector.load %arg25[%c3_63, %c0_64] : memref<30x128xbf16, #tpu.memory_space<vmem>>, vector<24x128xbf16>
    %71 = arith.extf %70 : vector<24x128xbf16> to vector<24x128xf32>
    %72 = arith.addf %71, %69 : vector<24x128xf32>
    %73 = arith.truncf %72 : vector<24x128xf32> to vector<24x128xbf16>
    %c0_65 = arith.constant 0 : index
    %c0_66 = arith.constant 0 : index
    %74 = vector.load %arg27[%c0_65, %c0_66] : memref<24x128xbf16, #tpu.memory_space<vmem>>, vector<24x128xbf16>
    tpu.vector_store %arg27[%c0_65, %c0_66], %73 {strides = array<i32>} : memref<24x128xbf16, #tpu.memory_space<vmem>>, vector<24x128xbf16>,
    %c0_67 = arith.constant 0 : index
    %c0_68 = arith.constant 0 : index
    %75 = vector.load %arg27[%c0_67, %c0_68] : memref<24x128xbf16, #tpu.memory_space<vmem>>, vector<6x128xbf16>
    %c0_69 = arith.constant 0 : index
    %c0_70 = arith.constant 0 : index
    %76 = vector.load %arg28[%c0_69, %c0_70] : memref<6x384xbf16, #tpu.memory_space<vmem>>, vector<6x128xbf16>
    tpu.vector_store %arg28[%c0_69, %c0_70], %75 {strides = array<i32>} : memref<6x384xbf16, #tpu.memory_space<vmem>>, vector<6x128xbf16>,
    %c9 = arith.constant 9 : index
    %c0_71 = arith.constant 0 : index
    %77 = vector.load %arg27[%c9, %c0_71] : memref<24x128xbf16, #tpu.memory_space<vmem>>, vector<6x128xbf16>
    %c0_72 = arith.constant 0 : index
    %c128_73 = arith.constant 128 : index
    %78 = vector.load %arg28[%c0_72, %c128_73] : memref<6x384xbf16, #tpu.memory_space<vmem>>, vector<6x128xbf16>
    tpu.vector_store %arg28[%c0_72, %c128_73], %77 {strides = array<i32>} : memref<6x384xbf16, #tpu.memory_space<vmem>>, vector<6x128xbf16>,
    %c18 = arith.constant 18 : index
    %c0_74 = arith.constant 0 : index
    %79 = vector.load %arg27[%c18, %c0_74] : memref<24x128xbf16, #tpu.memory_space<vmem>>, vector<6x128xbf16>
    %c0_75 = arith.constant 0 : index
    %c256_76 = arith.constant 256 : index
    %80 = vector.load %arg28[%c0_75, %c256_76] : memref<6x384xbf16, #tpu.memory_space<vmem>>, vector<6x128xbf16>
    tpu.vector_store %arg28[%c0_75, %c256_76], %79 {strides = array<i32>} : memref<6x384xbf16, #tpu.memory_space<vmem>>, vector<6x128xbf16>,
    %c0_77 = arith.constant 0 : index
    %c0_78 = arith.constant 0 : index
    %81 = vector.load %arg28[%c0_77, %c0_78] : memref<6x384xbf16, #tpu.memory_space<vmem>>, vector<6x384xbf16>
    %c0_79 = arith.constant 0 : index
    %c0_80 = arith.constant 0 : index
    %82 = vector.load %arg14[%c0_79, %c0_80] : memref<384x128xbf16, #tpu.memory_space<vmem>>, vector<384x128xbf16>
    %cst_81 = arith.constant dense<0.000000e+00> : vector<6x128xf32>
    %83 = tpu.matmul %81, %82, %cst_81 {dimension_numbers = #tpu.dot_dimension_numbers<[1], [0], [0], [1], [0, 0, 1, 1], [], []>} : vector<6x384xbf16>, vector<384x128xbf16>, vector<6x128xf32> -> vector<6x128xf32>
    %c0_82 = arith.constant 0 : index
    %c0_83 = arith.constant 0 : index
    %84 = vector.load %arg15[%c0_82, %c0_83] : memref<1x128xf32, #tpu.memory_space<vmem>>, vector<1x128xf32>
    %85 = vector.broadcast %84 : vector<1x128xf32> to vector<6x128xf32>
    %86 = arith.mulf %83, %85 : vector<6x128xf32>
    %c0_84 = arith.constant 0 : index
    %c0_85 = arith.constant 0 : index
    %87 = vector.load %arg16[%c0_84, %c0_85] : memref<1x128xf32, #tpu.memory_space<vmem>>, vector<1x128xf32>
    %88 = vector.broadcast %87 : vector<1x128xf32> to vector<6x128xf32>
    %89 = arith.addf %86, %88 : vector<6x128xf32>
    %cst_86 = arith.constant 0.000000e+00 : f32
    %90 = vector.broadcast %cst_86 : f32 to vector<6x128xf32>
    %91 = arith.maximumf %89, %90 : vector<6x128xf32>
    %92 = arith.truncf %91 : vector<6x128xf32> to vector<6x128xbf16>
    %c0_87 = arith.constant 0 : index
    %c0_88 = arith.constant 0 : index
    %93 = vector.load %arg17[%c0_87, %c0_88] : memref<128x128xbf16, #tpu.memory_space<vmem>>, vector<128x128xbf16>
    %cst_89 = arith.constant dense<0.000000e+00> : vector<6x128xf32>
    %94 = tpu.matmul %92, %93, %cst_89 {dimension_numbers = #tpu.dot_dimension_numbers<[1], [0], [0], [1], [0, 0, 1, 1], [], []>} : vector<6x128xbf16>, vector<128x128xbf16>, vector<6x128xf32> -> vector<6x128xf32>
    %c0_90 = arith.constant 0 : index
    %c0_91 = arith.constant 0 : index
    %95 = vector.load %arg18[%c0_90, %c0_91] : memref<1x128xf32, #tpu.memory_space<vmem>>, vector<1x128xf32>
    %96 = vector.broadcast %95 : vector<1x128xf32> to vector<6x128xf32>
    %97 = arith.mulf %94, %96 : vector<6x128xf32>
    %c0_92 = arith.constant 0 : index
    %c0_93 = arith.constant 0 : index
    %98 = vector.load %arg19[%c0_92, %c0_93] : memref<1x128xf32, #tpu.memory_space<vmem>>, vector<1x128xf32>
    %99 = vector.broadcast %98 : vector<1x128xf32> to vector<6x128xf32>
    %100 = arith.addf %97, %99 : vector<6x128xf32>
    %cst_94 = arith.constant 0.000000e+00 : f32
    %101 = vector.broadcast %cst_94 : f32 to vector<6x128xf32>
    %102 = arith.maximumf %100, %101 : vector<6x128xf32>
    %c9_95 = arith.constant 9 : index
    %c0_96 = arith.constant 0 : index
    %103 = vector.load %arg27[%c9_95, %c0_96] : memref<24x128xbf16, #tpu.memory_space<vmem>>, vector<6x128xbf16>
    %104 = arith.extf %103 : vector<6x128xbf16> to vector<6x128xf32>
    %105 = arith.addf %104, %102 : vector<6x128xf32>
    %106 = arith.truncf %105 : vector<6x128xf32> to vector<6x128xbf16>
    %c0_97 = arith.constant 0 : index
    %c0_98 = arith.constant 0 : index
    %107 = vector.load %arg29[%c0_97, %c0_98] : memref<6x128xbf16, #tpu.memory_space<vmem>>, vector<6x128xbf16>
    tpu.vector_store %arg29[%c0_97, %c0_98], %106 {strides = array<i32>} : memref<6x128xbf16, #tpu.memory_space<vmem>>, vector<6x128xbf16>,
    %c0_99 = arith.constant 0 : index
    %c0_100 = arith.constant 0 : index
    %108 = vector.load %arg29[%c0_99, %c0_100] : memref<6x128xbf16, #tpu.memory_space<vmem>>, vector<6x128xbf16>
    %c0_101 = arith.constant 0 : index
    %c0_102 = arith.constant 0 : index
    %109 = vector.load %arg20[%c0_101, %c0_102] : memref<128x128xbf16, #tpu.memory_space<vmem>>, vector<128x128xbf16>
    %cst_103 = arith.constant dense<0.000000e+00> : vector<6x128xf32>
    %110 = tpu.matmul %108, %109, %cst_103 {dimension_numbers = #tpu.dot_dimension_numbers<[1], [0], [0], [1], [0, 0, 1, 1], [], []>} : vector<6x128xbf16>, vector<128x128xbf16>, vector<6x128xf32> -> vector<6x128xf32>
    %c0_104 = arith.constant 0 : index
    %c0_105 = arith.constant 0 : index
    %111 = vector.load %arg21[%c0_104, %c0_105] : memref<1x128xf32, #tpu.memory_space<vmem>>, vector<1x128xf32>
    %112 = vector.broadcast %111 : vector<1x128xf32> to vector<6x128xf32>
    %113 = arith.addf %110, %112 : vector<6x128xf32>
    %c0_106 = arith.constant 0 : index
    %c0_107 = arith.constant 0 : index
    %c0_108 = arith.constant 0 : index
    %114 = vector.load %arg22[%c0_106, %c0_107, %c0_108] : memref<1x6x128xf32, #tpu.memory_space<vmem>>, vector<1x6x128xf32>
    %115 = vector.shape_cast %114 : vector<1x6x128xf32> to vector<6x128xf32>
    %116 = vector.shape_cast %113 : vector<6x128xf32> to vector<1x6x128xf32>
    tpu.vector_store %arg22[%c0_106, %c0_107, %c0_108], %116 {strides = array<i32>} : memref<1x6x128xf32, #tpu.memory_space<vmem>>, vector<1x6x128xf32>,
    return
  }
  func.func @transform_0(%arg0: i32) -> (i32, i32, i32) {
    %c0_i32 = arith.constant 0 : i32
    %c0_i32_0 = arith.constant 0 : i32
    %c0_i32_1 = arith.constant 0 : i32
    return %arg0, %c0_i32, %c0_i32_0 : i32, i32, i32
  }
  func.func @transform_1(%arg0: i32) -> (i32, i32, i32) {
    %c0_i32 = arith.constant 0 : i32
    %c0_i32_0 = arith.constant 0 : i32
    %c0_i32_1 = arith.constant 0 : i32
    return %arg0, %c0_i32, %c0_i32_0 : i32, i32, i32
  }
  func.func @transform_2(%arg0: i32) -> (i32, i32) {
    %c0_i32 = arith.constant 0 : i32
    %c0_i32_0 = arith.constant 0 : i32
    %c0_i32_1 = arith.constant 0 : i32
    return %c0_i32, %c0_i32_0 : i32, i32
  }
  func.func @transform_3(%arg0: i32) -> (i32, i32) {
    %c0_i32 = arith.constant 0 : i32
    %c0_i32_0 = arith.constant 0 : i32
    %c0_i32_1 = arith.constant 0 : i32
    return %c0_i32, %c0_i32_0 : i32, i32
  }
  func.func @transform_4(%arg0: i32) -> (i32, i32) {
    %c0_i32 = arith.constant 0 : i32
    %c0_i32_0 = arith.constant 0 : i32
    %c0_i32_1 = arith.constant 0 : i32
    return %c0_i32, %c0_i32_0 : i32, i32
  }
  func.func @transform_5(%arg0: i32) -> (i32, i32) {
    %c0_i32 = arith.constant 0 : i32
    %c0_i32_0 = arith.constant 0 : i32
    %c0_i32_1 = arith.constant 0 : i32
    return %c0_i32, %c0_i32_0 : i32, i32
  }
  func.func @transform_6(%arg0: i32) -> (i32, i32) {
    %c0_i32 = arith.constant 0 : i32
    %c0_i32_0 = arith.constant 0 : i32
    %c0_i32_1 = arith.constant 0 : i32
    return %c0_i32, %c0_i32_0 : i32, i32
  }
  func.func @transform_7(%arg0: i32) -> (i32, i32) {
    %c0_i32 = arith.constant 0 : i32
    %c0_i32_0 = arith.constant 0 : i32
    %c0_i32_1 = arith.constant 0 : i32
    return %c0_i32, %c0_i32_0 : i32, i32
  }
  func.func @transform_8(%arg0: i32) -> (i32, i32) {
    %c0_i32 = arith.constant 0 : i32
    %c0_i32_0 = arith.constant 0 : i32
    %c0_i32_1 = arith.constant 0 : i32
    return %c0_i32, %c0_i32_0 : i32, i32
  }
  func.func @transform_9(%arg0: i32) -> (i32, i32) {
    %c0_i32 = arith.constant 0 : i32
    %c0_i32_0 = arith.constant 0 : i32
    %c0_i32_1 = arith.constant 0 : i32
    return %c0_i32, %c0_i32_0 : i32, i32
  }
  func.func @transform_10(%arg0: i32) -> (i32, i32) {
    %c0_i32 = arith.constant 0 : i32
    %c0_i32_0 = arith.constant 0 : i32
    %c0_i32_1 = arith.constant 0 : i32
    return %c0_i32, %c0_i32_0 : i32, i32
  }
  func.func @transform_11(%arg0: i32) -> (i32, i32) {
    %c0_i32 = arith.constant 0 : i32
    %c0_i32_0 = arith.constant 0 : i32
    %c0_i32_1 = arith.constant 0 : i32
    return %c0_i32, %c0_i32_0 : i32, i32
  }
  func.func @transform_12(%arg0: i32) -> (i32, i32) {
    %c0_i32 = arith.constant 0 : i32
    %c0_i32_0 = arith.constant 0 : i32
    %c0_i32_1 = arith.constant 0 : i32
    return %c0_i32, %c0_i32_0 : i32, i32
  }
  func.func @transform_13(%arg0: i32) -> (i32, i32) {
    %c0_i32 = arith.constant 0 : i32
    %c0_i32_0 = arith.constant 0 : i32
    %c0_i32_1 = arith.constant 0 : i32
    return %c0_i32, %c0_i32_0 : i32, i32
  }
  func.func @transform_14(%arg0: i32) -> (i32, i32) {
    %c0_i32 = arith.constant 0 : i32
    %c0_i32_0 = arith.constant 0 : i32
    %c0_i32_1 = arith.constant 0 : i32
    return %c0_i32, %c0_i32_0 : i32, i32
  }
  func.func @transform_15(%arg0: i32) -> (i32, i32) {
    %c0_i32 = arith.constant 0 : i32
    %c0_i32_0 = arith.constant 0 : i32
    %c0_i32_1 = arith.constant 0 : i32
    return %c0_i32, %c0_i32_0 : i32, i32
  }
  func.func @transform_16(%arg0: i32) -> (i32, i32) {
    %c0_i32 = arith.constant 0 : i32
    %c0_i32_0 = arith.constant 0 : i32
    %c0_i32_1 = arith.constant 0 : i32
    return %c0_i32, %c0_i32_0 : i32, i32
  }
  func.func @transform_17(%arg0: i32) -> (i32, i32) {
    %c0_i32 = arith.constant 0 : i32
    %c0_i32_0 = arith.constant 0 : i32
    %c0_i32_1 = arith.constant 0 : i32
    return %c0_i32, %c0_i32_0 : i32, i32
  }
  func.func @transform_18(%arg0: i32) -> (i32, i32) {
    %c0_i32 = arith.constant 0 : i32
    %c0_i32_0 = arith.constant 0 : i32
    %c0_i32_1 = arith.constant 0 : i32
    return %c0_i32, %c0_i32_0 : i32, i32
  }
  func.func @transform_19(%arg0: i32) -> (i32, i32) {
    %c0_i32 = arith.constant 0 : i32
    %c0_i32_0 = arith.constant 0 : i32
    %c0_i32_1 = arith.constant 0 : i32
    return %c0_i32, %c0_i32_0 : i32, i32
  }
  func.func @transform_20(%arg0: i32) -> (i32, i32) {
    %c0_i32 = arith.constant 0 : i32
    %c0_i32_0 = arith.constant 0 : i32
    %c0_i32_1 = arith.constant 0 : i32
    return %c0_i32, %c0_i32_0 : i32, i32
  }
  func.func @transform_21(%arg0: i32) -> (i32, i32, i32) {
    %c0_i32 = arith.constant 0 : i32
    %c0_i32_0 = arith.constant 0 : i32
    %c0_i32_1 = arith.constant 0 : i32
    return %arg0, %c0_i32, %c0_i32_0 : i32, i32, i32
  }
}

</mosaic_0001>

<bundles_post_ra>
// kernel: tpu_custom_call.1
= control target key start
LH: loop header
LB: loop body
LE: loop exit
PB: predicated region body
PF: predicated region fallthrough
CT: control target
= control target key end

     0   :  { %s5715_s0 = inlined_call_operand.hbm [shape: f32[2,32,8], index: 0, kind: input, shape index: {}]   ;;  %s5716_s1 = inlined_call_operand.hbm [shape: f32[2,32,4], index: 1, kind: input, shape index: {}]   ;;  %s5717_s2 = inlined_call_operand.hbm [shape: f32[4,128], index: 2, kind: input, shape index: {}]   ;;  %s5718_s3 = inlined_call_operand.hbm [shape: f32[8,128], index: 3, kind: input, shape index: {}]   ;;  %s5719_s4 = inlined_call_operand.hbm [shape: bf16[384,128], index: 4, kind: input, shape index: {}]   ;;  %s5720_s5 = inlined_call_operand.hbm [shape: f32[1,128], index: 5, kind: input, shape index: {}]   ;;  %s5721_s6 = inlined_call_operand.hbm [shape: f32[1,128], index: 6, kind: input, shape index: {}]   ;;  %s5722_s7 = inlined_call_operand.hbm [shape: bf16[384,128], index: 7, kind: input, shape index: {}]   ;;  %s5723_s8 = inlined_call_operand.hbm [shape: f32[1,128], index: 8, kind: input, shape index: {}]   ;;  %s5724_s9 = inlined_call_operand.hbm [shape: f32[1,128], index: 9, kind: input, shape index: {}]   ;;  %s5725_s10 = inlined_call_operand.hbm [shape: bf16[128,128], index: 10, kind: input, shape index: {}]   ;;  %s5726_s11 = inlined_call_operand.hbm [shape: f32[1,128], index: 11, kind: input, shape index: {}]   ;;  %s5727_s12 = inlined_call_operand.hbm [shape: f32[1,128], index: 12, kind: input, shape index: {}]   ;;  %s5728_s13 = inlined_call_operand.hbm [shape: bf16[384,128], index: 13, kind: input, shape index: {}]   ;;  %s5729_s14 = inlined_call_operand.hbm [shape: f32[1,128], index: 14, kind: input, shape index: {}]   ;;  %s5730_s15 = inlined_call_operand.hbm [shape: f32[1,128], index: 15, kind: input, shape index: {}]   ;;  %s5731_s16 = inlined_call_operand.hbm [shape: bf16[128,128], index: 16, kind: input, shape index: {}]   ;;  %s5732_s17 = inlined_call_operand.hbm [shape: f32[1,128], index: 17, kind: input, shape index: {}]   ;;  %s5733_s18 = inlined_call_operand.hbm [shape: f32[1,128], index: 18, kind: input, shape index: {}]   ;;  %s5734_s19 = inlined_call_operand.hbm [shape: bf16[128,128], index: 19, kind: input, shape index: {}]   ;;  %s5735_s20 = inlined_call_operand.hbm [shape: f32[1,128], index: 20, kind: input, shape index: {}]   ;;  %s5736_s21 = inlined_call_operand.hbm [shape: f32[2,6,128], index: 21, kind: output, shape index: {}]  }
   0x1   :  { %5765 = sst [smem:[#allocation62_spill]] %s5715_s0 }
   0x2   :  { %5766 = sst [smem:[#allocation63_spill]] %s5716_s1 }
   0x3   :  { %5767 = sst [smem:[#allocation64_spill]] %s5717_s2 }
   0x4   :  { %5768 = sst [smem:[#allocation65_spill]] %s5718_s3 }
   0x5   :  { %5769 = sst [smem:[#allocation66_spill]] %s5719_s4 }
   0x6   :  { %5770 = sst [smem:[#allocation67_spill]] %s5720_s5 }
   0x7   :  { %5771 = sst [smem:[#allocation68_spill]] %s5721_s6 }
   0x8   :  { %5772 = sst [smem:[#allocation69_spill]] %s5722_s7 }
   0x9   :  { %5773 = sst [smem:[#allocation70_spill]] %s5723_s8 }
   0xa   :  { %5774 = sst [smem:[#allocation71_spill]] %s5724_s9 }
   0xb   :  { %5775 = sst [smem:[#allocation72_spill]] %s5725_s10 }
   0xc   :  { %5776 = sst [smem:[#allocation73_spill]] %s5726_s11 }
   0xd   :  { %5777 = sst [smem:[#allocation74_spill]] %s5727_s12 }
   0xe   :  { %5778 = sst [smem:[#allocation75_spill]] %s5728_s13 }
   0xf   :  { %5779 = sst [smem:[#allocation76_spill]] %s5736_s21 }
  0x10   :  { %26 = vsyncpa [#allocation10], 0 }
  0x11   :  { %28 = vsyncpa [#allocation10 + $0x1], 0 }
  0x12   :  { %29 = vsyncpa [#allocation13], 0 }
  0x13   :  { %31 = vsyncpa [#allocation13 + $0x1], 0 }
  0x14   :  { %32 = vsyncpa [#allocation16], 0 }
  0x15   :  { %33 = vsyncpa [#allocation19], 0 }
  0x16   :  { %34 = vsyncpa [#allocation22], 0 }
  0x17   :  { %35 = vsyncpa [#allocation25], 0 }
  0x18   :  { %36 = vsyncpa [#allocation28], 0 }
  0x19   :  { %37 = vsyncpa [#allocation31], 0 }
  0x1a   :  { %38 = vsyncpa [#allocation34], 0 }
  0x1b   :  { %39 = vsyncpa [#allocation37], 0 }
  0x1c   :  { %40 = vsyncpa [#allocation40], 0 }
  0x1d   :  { %41 = vsyncpa [#allocation11], 0 }
  0x1e   :  { %43 = vsyncpa [#allocation11 + $0x1], 0  ;;  %s4962_s2 = smov 0   ;;  %s4964_s25 = smov 0  }
  0x1f   :  { %s4966_s26 = smov 0   ;;  %s4968_s27 = smov 0  }
  0x20 LB: > { %5780 = sst [smem:[#allocation56_spill]] %s4810_s2  ;;  %s4824_s3 = smov [#allocation14]   ;;  %s4822_s27 = sphi %s4968_s27, %s5384_s27   ;;  %s4818_s26 = sphi %s4966_s26, %s5858_s26   ;;  %s4814_s25 = sphi %s4964_s25, %s5857_s25   ;;  %s4810_s2 = sphi %s4962_s2, %s5856_s2  }
  0x21   : > { %5781 = sst [smem:[#allocation57_spill]] %s4814_s25  ;;  %s544_s28 = sshll.u32 %s4824_s3, 4  ;;  %s545_s28 = int_to_ptr.vmem [resolvable:$true] %s544_s28 }
  0x22   : > { %5782 = sst [smem:[#allocation58_spill]] %s4818_s26  ;;  %s4983_s29 = sadd.s32 4294967295, %s4822_s27  }
  0x23   : > { %5783 = sst [smem:[#allocation59_spill]] %s4822_s27  ;;  %p3234_p0 = scmp.ge.s32.totalorder %s4822_s27, 1 }
  0x24   : > { %5784 = sst [smem:[#allocation60_spill]] %s4983_s29  ;;  %p5748_p1 = scmp.eq.s32.totalorder %s4983_s29, 0 }
  0x25   : > { %p531_p2 = scmp.lt.s32.totalorder %s4822_s27, 3  ;;  %s4825_s4 = smov [#allocation15]  }
  0x26   : > { %s555_s30 = sshll.u32 %s4825_s4, 4  ;;  %s4826_s5 = smov [#allocation18]   ;;  %s4995_s30 = int_to_ptr.vmem [resolvable:$true] %s555_s30 }
  0x27   : > { %p4988_p3 = pnand %p3234_p0, %p531_p2  ;;  %s579_s22 = sshll.u32 %s4826_s5, 4  ;;  %s5003_s22 = int_to_ptr.vmem [resolvable:$true] %s579_s22 }
  0x28   : > { %s5788_s3 = sld [smem:[#allocation64_spill]] }
  0x29   : > { %s5785_s0 = scalar_select %p4988_p3, 1, 0 }
  0x2a   : > { %p3822_p5 = pneg %p4988_p3 }
  0x2b   : > { %5786 = sst [smem:[#allocation61_spill]] %s5785_s0 }
  0x2c   : > { %p4999_p6 = pnand %p3822_p5, %p5748_p1 }
  0x2e   : > { %s4120_s21 = scalar_lea.hbm %s5788_s3, 64  ;;  %p5013_p8 = pneg %p4999_p6 }
  0x2f   : > { %p4121_p7 = scmp.ne.s32.totalorder %s5788_s3, %s4120_s21  ;;  %p4127_p11 = scmp.lt.u32.totalorder %s4120_s21, %s5788_s3 }
  0x31   : > { %p4123_p9 = pnand %p5013_p8, %p4121_p7 }
  0x33   : > { %p4124_p10 = pneg %p4123_p9 }
  0x35   : > { %p4129_p12 = pnand %p4127_p11, %p4124_p10 }
  0x37   : > { %4132 = shalt.err (!%p4129_p12)
}
  0x38   : > { %s4133_s1 = scalar_lea.vmem %s545_s28, 64  ;;  %p4141_p5 = scmp.lt.s32.totalorder %s545_s28, %s545_s28 }
  0x39   : > { %p4134_p13 = scmp.ne.s32.totalorder %s545_s28, %s4133_s1  ;;  %p4142_p4 = scmp.lt.s32.totalorder %s4133_s1, %s4133_s1 }
  0x3b   : > { %p4136_p0 = pnand %p4134_p13, %p5013_p8  ;;  %p4143_p1 = por %p4142_p4, %p4141_p5 }
  0x3d   : > { %p4137_p2 = pneg %p4136_p0 }
  0x3f   : > { %p4144_p3 = pnand %p4143_p1, %p4137_p2 }
  0x41   : > { %4147 = shalt.err (!%p4144_p3)
}
  0x42   : > { %3825 = dma.hbm_to_vmem [thread:$0]  (!%p4999_p6), %s5788_s3, 64, %s545_s28, [#allocation13]  }
  0x43   : > { %s5790_s24 = sld [smem:[#allocation65_spill]] }
  0x49   : > { %s4148_s5 = scalar_lea.hbm %s5790_s24, 128 }
  0x4a   : > { %p4149_p7 = scmp.ne.s32.totalorder %s5790_s24, %s4148_s5  ;;  %p4155_p1 = scmp.lt.u32.totalorder %s4148_s5, %s5790_s24 }
  0x4c   : > { %p4151_p9 = pnand %p4149_p7, %p5013_p8 }
  0x4e   : > { %p4152_p4 = pneg %p4151_p9 }
  0x50   : > { %p4157_p3 = pnand %p4155_p1, %p4152_p4 }
  0x52   : > { %4160 = shalt.err (!%p4157_p3)
}
  0x53   : > { %s4161_s28 = scalar_lea.vmem %s4995_s30, 128  ;;  %p4169_p13 = scmp.lt.s32.totalorder %s4995_s30, %s4995_s30 }
  0x54   : > { %p4162_p10 = scmp.ne.s32.totalorder %s4995_s30, %s4161_s28  ;;  %p4170_p0 = scmp.lt.s32.totalorder %s4161_s28, %s4161_s28 }
  0x56   : > { %p4164_p11 = pnand %p4162_p10, %p5013_p8  ;;  %p4171_p2 = por %p4170_p0, %p4169_p13 }
  0x58   : > { %p4165_p12 = pneg %p4164_p11 }
  0x5a   : > { %p4172_p5 = pnand %p4171_p2, %p4165_p12 }
  0x5c   : > { %4175 = shalt.err (!%p4172_p5)
}
  0x5d   : > { %3828 = dma.hbm_to_vmem [thread:$0]  (!%p4999_p6), %s5790_s24, 128, %s4995_s30, [#allocation16]  }
  0x5e   : > { %s5791_s0 = sld [smem:[#allocation67_spill]] }
  0x64   : > { %s4176_s21 = scalar_lea.hbm %s5791_s0, 16 }
  0x65   : > { %p4177_p7 = scmp.ne.s32.totalorder %s5791_s0, %s4176_s21  ;;  %p4183_p1 = scmp.lt.u32.totalorder %s4176_s21, %s5791_s0 }
  0x67   : > { %p4179_p9 = pnand %p4177_p7, %p5013_p8 }
  0x69   : > { %p4180_p4 = pneg %p4179_p9 }
  0x6b   : > { %p4185_p3 = pnand %p4183_p1, %p4180_p4 }
  0x6d   : > { %4188 = shalt.err (!%p4185_p3)
}
  0x6e   : > { %s4189_s30 = scalar_lea.vmem %s5003_s22, 16  ;;  %s4196_s25 = scalar_lea.vmem %s5003_s22, 32 }
  0x6f   : > { %p4190_p10 = scmp.ne.s32.totalorder %s5003_s22, %s4189_s30  ;;  %p4197_p13 = scmp.lt.s32.totalorder %s5003_s22, %s5003_s22 }
  0x70   : > { %p4198_p0 = scmp.lt.s32.totalorder %s4196_s25, %s4189_s30 }
  0x71   : > { %p4192_p11 = pnand %p4190_p10, %p5013_p8 }
  0x72   : > { %p4199_p2 = por %p4198_p0, %p4197_p13 }
  0x73   : > { %p4193_p12 = pneg %p4192_p11 }
  0x75   : > { %p4200_p5 = pnand %p4199_p2, %p4193_p12 }
  0x77   : > { %4203 = shalt.err (!%p4200_p5)
}
  0x78   : > { %3834 = dma.hbm_to_vmem [thread:$0]  (!%p4999_p6), %s5791_s0, 16, %s5003_s22, [#allocation19]  }
  0x79   : > { %s4827_s2 = smov [#allocation21]   ;;  %s4828_s29 = smov [#allocation24]  }
  0x7a   : > { %s600_s21 = sshll.u32 %s4827_s2, 4  ;;  %s625_s5 = sshll.u32 %s4828_s29, 4  ;;  %s601_s21 = int_to_ptr.vmem [resolvable:$true] %s600_s21  ;;  %s626_s5 = int_to_ptr.vmem [resolvable:$true] %s625_s5 }
  0x7b   : > { %s5792_s7 = sld [smem:[#allocation69_spill]] }
  0x81   : > { %s4204_s30 = scalar_lea.hbm %s5792_s7, 3072 }
  0x82   : > { %p4205_p7 = scmp.ne.s32.totalorder %s5792_s7, %s4204_s30  ;;  %p4211_p1 = scmp.lt.u32.totalorder %s4204_s30, %s5792_s7 }
  0x84   : > { %p4207_p9 = pnand %p4205_p7, %p5013_p8 }
  0x86   : > { %p4208_p4 = pneg %p4207_p9 }
  0x88   : > { %p4213_p3 = pnand %p4211_p1, %p4208_p4 }
  0x8a   : > { %4216 = shalt.err (!%p4213_p3)
}
  0x8b   : > { %s4217_s22 = scalar_lea.vmem %s601_s21, 3072  ;;  %p4225_p13 = scmp.lt.s32.totalorder %s601_s21, %s601_s21 }
  0x8c   : > { %p4218_p10 = scmp.ne.s32.totalorder %s601_s21, %s4217_s22  ;;  %p4226_p0 = scmp.lt.s32.totalorder %s4217_s22, %s4217_s22 }
  0x8e   : > { %p4220_p11 = pnand %p4218_p10, %p5013_p8  ;;  %p4227_p2 = por %p4226_p0, %p4225_p13 }
  0x90   : > { %p4221_p12 = pneg %p4220_p11 }
  0x92   : > { %p4228_p5 = pnand %p4227_p2, %p4221_p12 }
  0x94   : > { %4231 = shalt.err (!%p4228_p5)
}
  0x95   : > { %s5756_s3 = smov 64   ;;  %s5758_s27 = smov 4  }
  0x96   : > { %3840 = dma.hbm_to_vmem [thread:$0]  (!%p4999_p6), %s5792_s7, 3072, %s601_s21, [#allocation22], %s5756_s3, %s5756_s3, %s5758_s27  }
  0x97   : > { %s5793_s9 = sld [smem:[#allocation71_spill]] }
  0x9d   : > { %s4232_s28 = scalar_lea.hbm %s5793_s9, 16 }
  0x9e   : > { %p4233_p7 = scmp.ne.s32.totalorder %s5793_s9, %s4232_s28  ;;  %p4239_p1 = scmp.lt.u32.totalorder %s4232_s28, %s5793_s9 }
  0xa0   : > { %p4235_p9 = pnand %p4233_p7, %p5013_p8 }
  0xa2   : > { %p4236_p4 = pneg %p4235_p9 }
  0xa4   : > { %p4241_p3 = pnand %p4239_p1, %p4236_p4 }
  0xa6   : > { %4244 = shalt.err (!%p4241_p3)
}
  0xa7   : > { %s4245_s24 = scalar_lea.vmem %s626_s5, 16  ;;  %s4252_s21 = scalar_lea.vmem %s626_s5, 32 }
  0xa8   : > { %p4246_p10 = scmp.ne.s32.totalorder %s626_s5, %s4245_s24  ;;  %p4253_p13 = scmp.lt.s32.totalorder %s626_s5, %s626_s5 }
  0xa9   : > { %p4254_p0 = scmp.lt.s32.totalorder %s4252_s21, %s4245_s24 }
  0xaa   : > { %p4248_p11 = pnand %p4246_p10, %p5013_p8 }
  0xab   : > { %p4255_p2 = por %p4254_p0, %p4253_p13 }
  0xac   : > { %p4249_p12 = pneg %p4248_p11 }
  0xae   : > { %p4256_p5 = pnand %p4255_p2, %p4249_p12 }
  0xb0   : > { %4259 = shalt.err (!%p4256_p5)
}
  0xb1   : > { %3846 = dma.hbm_to_vmem [thread:$0]  (!%p4999_p6), %s5793_s9, 16, %s626_s5, [#allocation25]  }
  0xb2   : > { %s4831_s1 = smov [#allocation27]   ;;  %s4832_s30 = smov [#allocation30]  }
  0xb3   : > { %s649_s28 = sshll.u32 %s4831_s1, 4  ;;  %s670_s25 = sshll.u32 %s4832_s30, 4  ;;  %s650_s28 = int_to_ptr.vmem [resolvable:$true] %s649_s28  ;;  %s671_s25 = int_to_ptr.vmem [resolvable:$true] %s670_s25 }
  0xb4   : > { %s5794_s11 = sld [smem:[#allocation73_spill]] }
  0xba   : > { %s4260_s3 = scalar_lea.hbm %s5794_s11, 16 }
  0xbb   : > { %p4261_p7 = scmp.ne.s32.totalorder %s5794_s11, %s4260_s3  ;;  %p4267_p1 = scmp.lt.u32.totalorder %s4260_s3, %s5794_s11 }
  0xbd   : > { %p4263_p9 = pnand %p4261_p7, %p5013_p8 }
  0xbf   : > { %p4264_p4 = pneg %p4263_p9 }
  0xc1   : > { %p4269_p3 = pnand %p4267_p1, %p4264_p4 }
  0xc3   : > { %4272 = shalt.err (!%p4269_p3)
}
  0xc4   : > { %s4273_s5 = scalar_lea.vmem %s650_s28, 16  ;;  %s4280_s29 = scalar_lea.vmem %s650_s28, 32 }
  0xc5   : > { %p4274_p10 = scmp.ne.s32.totalorder %s650_s28, %s4273_s5  ;;  %p4281_p13 = scmp.lt.s32.totalorder %s650_s28, %s650_s28 }
  0xc6   : > { %p4282_p0 = scmp.lt.s32.totalorder %s4280_s29, %s4273_s5 }
  0xc7   : > { %p4276_p11 = pnand %p4274_p10, %p5013_p8 }
  0xc8   : > { %p4283_p2 = por %p4282_p0, %p4281_p13 }
  0xc9   : > { %p4277_p12 = pneg %p4276_p11 }
  0xcb   : > { %p4284_p5 = pnand %p4283_p2, %p4277_p12 }
  0xcd   : > { %4287 = shalt.err (!%p4284_p5)
}
  0xce   : > { %3852 = dma.hbm_to_vmem [thread:$0]  (!%p4999_p6), %s5794_s11, 16, %s650_s28, [#allocation28]  }
  0xcf   : > { %s5795_s13 = sld [smem:[#allocation75_spill]] }
  0xd5   : > { %s4288_s26 = scalar_lea.hbm %s5795_s13, 3072 }
  0xd6   : > { %p4289_p7 = scmp.ne.s32.totalorder %s5795_s13, %s4288_s26  ;;  %p4295_p1 = scmp.lt.u32.totalorder %s4288_s26, %s5795_s13 }
  0xd8   : > { %p4291_p9 = pnand %p4289_p7, %p5013_p8 }
  0xda   : > { %p4292_p4 = pneg %p4291_p9 }
  0xdc   : > { %p4297_p3 = pnand %p4295_p1, %p4292_p4 }
  0xde   : > { %4300 = shalt.err (!%p4297_p3)
}
  0xdf   : > { %s4301_s5 = scalar_lea.vmem %s671_s25, 3072  ;;  %p4309_p13 = scmp.lt.s32.totalorder %s671_s25, %s671_s25 }
  0xe0   : > { %p4302_p10 = scmp.ne.s32.totalorder %s671_s25, %s4301_s5  ;;  %p4310_p0 = scmp.lt.s32.totalorder %s4301_s5, %s4301_s5 }
  0xe2   : > { %p4304_p11 = pnand %p4302_p10, %p5013_p8  ;;  %p4311_p2 = por %p4310_p0, %p4309_p13 }
  0xe4   : > { %p4305_p12 = pneg %p4304_p11 }
  0xe6   : > { %p4312_p5 = pnand %p4311_p2, %p4305_p12 }
  0xe8   : > { %4315 = shalt.err (!%p4312_p5)
}
  0xe9   : > { %s5796_s28 = smov 4   ;;  %s5797_s29 = smov 64  }
  0xea   : > { %3858 = dma.hbm_to_vmem [thread:$0]  (!%p4999_p6), %s5795_s13, 3072, %s671_s25, [#allocation31], %s5797_s29, %s5797_s29, %s5796_s28  }
  0xeb   : > { %s4833_s3 = smov [#allocation33]   ;;  %s4834_s26 = smov [#allocation36]  }
  0xec   : > { %s695_s27 = sshll.u32 %s4833_s3, 4  ;;  %s719_s22 = sshll.u32 %s4834_s26, 4  ;;  %s696_s27 = int_to_ptr.vmem [resolvable:$true] %s695_s27  ;;  %s720_s22 = int_to_ptr.vmem [resolvable:$true] %s719_s22 }
  0xed   : > { %s4316_s2 = scalar_lea.hbm %s5730_s15, 16 }
  0xee   : > { %p4317_p7 = scmp.ne.s32.totalorder %s5730_s15, %s4316_s2  ;;  %p4323_p1 = scmp.lt.u32.totalorder %s4316_s2, %s5730_s15 }
  0xf0   : > { %p4319_p9 = pnand %p4317_p7, %p5013_p8 }
  0xf2   : > { %p4320_p4 = pneg %p4319_p9 }
  0xf4   : > { %p4325_p3 = pnand %p4323_p1, %p4320_p4 }
  0xf6   : > { %4328 = shalt.err (!%p4325_p3)
}
  0xf7   : > { %s4329_s25 = scalar_lea.vmem %s696_s27, 16  ;;  %s4336_s30 = scalar_lea.vmem %s696_s27, 32 }
  0xf8   : > { %p4330_p10 = scmp.ne.s32.totalorder %s696_s27, %s4329_s25  ;;  %p4337_p13 = scmp.lt.s32.totalorder %s696_s27, %s696_s27 }
  0xf9   : > { %p4338_p0 = scmp.lt.s32.totalorder %s4336_s30, %s4329_s25 }
  0xfa   : > { %p4332_p11 = pnand %p4330_p10, %p5013_p8 }
  0xfb   : > { %p4339_p2 = por %p4338_p0, %p4337_p13 }
  0xfc   : > { %p4333_p12 = pneg %p4332_p11 }
  0xfe   : > { %p4340_p5 = pnand %p4339_p2, %p4333_p12 }
 0x100   : > { %4343 = shalt.err (!%p4340_p5)
}
 0x101   : > { %3864 = dma.hbm_to_vmem [thread:$0]  (!%p4999_p6), %s5730_s15, 16, %s696_s27, [#allocation34]  }
 0x102   : > { %s4344_s24 = scalar_lea.hbm %s5732_s17, 16 }
 0x103   : > { %p4345_p7 = scmp.ne.s32.totalorder %s5732_s17, %s4344_s24  ;;  %p4351_p1 = scmp.lt.u32.totalorder %s4344_s24, %s5732_s17 }
 0x105   : > { %p4347_p9 = pnand %p4345_p7, %p5013_p8 }
 0x107   : > { %p4348_p4 = pneg %p4347_p9 }
 0x109   : > { %p4353_p3 = pnand %p4351_p1, %p4348_p4 }
 0x10b   : > { %4356 = shalt.err (!%p4353_p3)
}
 0x10c   : > { %s4357_s25 = scalar_lea.vmem %s720_s22, 16  ;;  %s4364_s27 = scalar_lea.vmem %s720_s22, 32 }
 0x10d   : > { %p4358_p10 = scmp.ne.s32.totalorder %s720_s22, %s4357_s25  ;;  %p4365_p13 = scmp.lt.s32.totalorder %s720_s22, %s720_s22 }
 0x10e   : > { %p4366_p0 = scmp.lt.s32.totalorder %s4364_s27, %s4357_s25 }
 0x10f   : > { %p4360_p11 = pnand %p4358_p10, %p5013_p8 }
 0x110   : > { %p4367_p2 = por %p4366_p0, %p4365_p13 }
 0x111   : > { %p4361_p12 = pneg %p4360_p11 }
 0x113   : > { %p4368_p5 = pnand %p4367_p2, %p4361_p12 }
 0x115   : > { %4371 = shalt.err (!%p4368_p5)
}
 0x116   : > { %3870 = dma.hbm_to_vmem [thread:$0]  (!%p4999_p6), %s5732_s17, 16, %s720_s22, [#allocation37]  }
 0x117   : > { %s4835_s3 = smov [#allocation39]   ;;  %s4836_s26 = smov [#allocation17]  }
 0x118   : > { %s740_s7 = sshll.u32 %s4835_s3, 4  ;;  %s565_s24 = sshll.u32 %s4836_s26, 4  ;;  %s741_s7 = int_to_ptr.vmem [resolvable:$true] %s740_s7  ;;  %s566_s24 = int_to_ptr.vmem [resolvable:$true] %s565_s24 }
 0x119   : > { %s4372_s5 = scalar_lea.hbm %s5734_s19, 1024 }
 0x11a   : > { %p4373_p7 = scmp.ne.s32.totalorder %s5734_s19, %s4372_s5  ;;  %p4379_p1 = scmp.lt.u32.totalorder %s4372_s5, %s5734_s19 }
 0x11c   : > { %p4375_p9 = pnand %p4373_p7, %p5013_p8 }
 0x11e   : > { %p4376_p4 = pneg %p4375_p9 }
 0x120   : > { %p4381_p3 = pnand %p4379_p1, %p4376_p4 }
 0x122   : > { %4384 = shalt.err (!%p4381_p3)
}
 0x123   : > { %s4385_s22 = scalar_lea.vmem %s741_s7, 1024  ;;  %p4393_p13 = scmp.lt.s32.totalorder %s741_s7, %s741_s7 }
 0x124   : > { %p4386_p10 = scmp.ne.s32.totalorder %s741_s7, %s4385_s22  ;;  %p4394_p0 = scmp.lt.s32.totalorder %s4385_s22, %s4385_s22 }
 0x126   : > { %p4388_p11 = pnand %p4386_p10, %p5013_p8  ;;  %p4395_p2 = por %p4394_p0, %p4393_p13 }
 0x128   : > { %p4389_p12 = pneg %p4388_p11 }
 0x12a   : > { %p4396_p5 = pnand %p4395_p2, %p4389_p12 }
 0x12c   : > { %4399 = shalt.err (!%p4396_p5)
}
 0x12d   : > { %3876 = dma.hbm_to_vmem [thread:$0]  (!%p4999_p6), %s5734_s19, 1024, %s741_s7, [#allocation40], %s5797_s29, %s5797_s29, %s5796_s28  }
 0x12e   : > { %s5798_s2 = sld [smem:[#allocation66_spill]] }
 0x134   : > { %s5799_s5 = smov %s5798_s2  ;;  %s4400_s1 = scalar_lea.hbm %s5798_s2, 3072 }
 0x135   : > { %p4401_p7 = scmp.ne.s32.totalorder %s5799_s5, %s4400_s1  ;;  %p4407_p1 = scmp.lt.u32.totalorder %s4400_s1, %s5799_s5 }
 0x137   : > { %p4403_p9 = pnand %p4401_p7, %p5013_p8 }
 0x139   : > { %p4404_p4 = pneg %p4403_p9 }
 0x13b   : > { %p4409_p3 = pnand %p4407_p1, %p4404_p4 }
 0x13d   : > { %4412 = shalt.err (!%p4409_p3)
}
 0x13e   : > { %s4413_s0 = scalar_lea.vmem %s566_s24, 3072  ;;  %p4421_p13 = scmp.lt.s32.totalorder %s566_s24, %s566_s24 }
 0x13f   : > { %p4414_p10 = scmp.ne.s32.totalorder %s566_s24, %s4413_s0  ;;  %p4422_p0 = scmp.lt.s32.totalorder %s4413_s0, %s4413_s0 }
 0x141   : > { %p4416_p11 = pnand %p4414_p10, %p5013_p8  ;;  %p4423_p2 = por %p4422_p0, %p4421_p13 }
 0x143   : > { %p4417_p12 = pneg %p4416_p11 }
 0x145   : > { %p4424_p5 = pnand %p4423_p2, %p4417_p12 }
 0x147   : > { %4427 = shalt.err (!%p4424_p5)
}
 0x148   : > { %3831 = dma.hbm_to_vmem [thread:$0]  (!%p4999_p6), %s5799_s5, 3072, %s566_s24, [#allocation16], %s5797_s29, %s5797_s29, %s5796_s28  }
 0x149   : > { %s4837_s26 = smov [#allocation20]   ;;  %s4838_s2 = smov [#allocation23]  }
 0x14a   : > { %s590_s21 = sshll.u32 %s4837_s26, 4  ;;  %s614_s1 = sshll.u32 %s4838_s2, 4  ;;  %s591_s21 = int_to_ptr.vmem [resolvable:$true] %s590_s21  ;;  %s615_s1 = int_to_ptr.vmem [resolvable:$true] %s614_s1 }
 0x14b   : > { %s5800_s6 = sld [smem:[#allocation68_spill]] }
 0x151   : > { %s4428_s30 = scalar_lea.hbm %s5800_s6, 16 }
 0x152   : > { %p4429_p7 = scmp.ne.s32.totalorder %s5800_s6, %s4428_s30  ;;  %p4435_p1 = scmp.lt.u32.totalorder %s4428_s30, %s5800_s6 }
 0x154   : > { %p4431_p9 = pnand %p4429_p7, %p5013_p8 }
 0x156   : > { %p4432_p4 = pneg %p4431_p9 }
 0x158   : > { %p4437_p3 = pnand %p4435_p1, %p4432_p4 }
 0x15a   : > { %4440 = shalt.err (!%p4437_p3)
}
 0x15b   : > { %s4441_s24 = scalar_lea.vmem %s591_s21, 16  ;;  %s4448_s3 = scalar_lea.vmem %s591_s21, 32 }
 0x15c   : > { %p4442_p10 = scmp.ne.s32.totalorder %s591_s21, %s4441_s24  ;;  %p4449_p13 = scmp.lt.s32.totalorder %s591_s21, %s591_s21 }
 0x15d   : > { %p4450_p0 = scmp.lt.s32.totalorder %s4448_s3, %s4441_s24 }
 0x15e   : > { %p4444_p11 = pnand %p4442_p10, %p5013_p8 }
 0x15f   : > { %p4451_p2 = por %p4450_p0, %p4449_p13 }
 0x160   : > { %p4445_p12 = pneg %p4444_p11 }
 0x162   : > { %p4452_p5 = pnand %p4451_p2, %p4445_p12 }
 0x164   : > { %4455 = shalt.err (!%p4452_p5)
}
 0x165   : > { %3837 = dma.hbm_to_vmem [thread:$0]  (!%p4999_p6), %s5800_s6, 16, %s591_s21, [#allocation19]  }
 0x166   : > { %s5801_s8 = sld [smem:[#allocation70_spill]] }
 0x16c   : > { %s4456_s27 = scalar_lea.hbm %s5801_s8, 16 }
 0x16d   : > { %p4457_p7 = scmp.ne.s32.totalorder %s5801_s8, %s4456_s27  ;;  %p4463_p1 = scmp.lt.u32.totalorder %s4456_s27, %s5801_s8 }
 0x16f   : > { %p4459_p9 = pnand %p4457_p7, %p5013_p8 }
 0x171   : > { %p4460_p4 = pneg %p4459_p9 }
 0x173   : > { %p4465_p3 = pnand %p4463_p1, %p4460_p4 }
 0x175   : > { %4468 = shalt.err (!%p4465_p3)
}
 0x176   : > { %s4469_s24 = scalar_lea.vmem %s615_s1, 16  ;;  %s4476_s21 = scalar_lea.vmem %s615_s1, 32 }
 0x177   : > { %p4470_p10 = scmp.ne.s32.totalorder %s615_s1, %s4469_s24  ;;  %p4477_p13 = scmp.lt.s32.totalorder %s615_s1, %s615_s1 }
 0x178   : > { %p4478_p0 = scmp.lt.s32.totalorder %s4476_s21, %s4469_s24 }
 0x179   : > { %p4472_p11 = pnand %p4470_p10, %p5013_p8 }
 0x17a   : > { %p4479_p2 = por %p4478_p0, %p4477_p13 }
 0x17b   : > { %p4473_p12 = pneg %p4472_p11 }
 0x17d   : > { %p4480_p5 = pnand %p4479_p2, %p4473_p12 }
 0x17f   : > { %4483 = shalt.err (!%p4480_p5)
}
 0x180   : > { %3843 = dma.hbm_to_vmem [thread:$0]  (!%p4999_p6), %s5801_s8, 16, %s615_s1, [#allocation22]  }
 0x181   : > { %s4839_s2 = smov [#allocation26]   ;;  %s4840_s25 = smov [#allocation29]  }
 0x182   : > { %s635_s9 = sshll.u32 %s4839_s2, 4  ;;  %s660_s27 = sshll.u32 %s4840_s25, 4  ;;  %s636_s9 = int_to_ptr.vmem [resolvable:$true] %s635_s9  ;;  %s661_s27 = int_to_ptr.vmem [resolvable:$true] %s660_s27 }
 0x183   : > { %s5802_s10 = sld [smem:[#allocation72_spill]] }
 0x189   : > { %s4484_s0 = scalar_lea.hbm %s5802_s10, 1024 }
 0x18a   : > { %p4485_p7 = scmp.ne.s32.totalorder %s5802_s10, %s4484_s0  ;;  %p4491_p1 = scmp.lt.u32.totalorder %s4484_s0, %s5802_s10 }
 0x18c   : > { %p4487_p9 = pnand %p4485_p7, %p5013_p8 }
 0x18e   : > { %p4488_p4 = pneg %p4487_p9 }
 0x190   : > { %p4493_p3 = pnand %p4491_p1, %p4488_p4 }
 0x192   : > { %4496 = shalt.err (!%p4493_p3)
}
 0x193   : > { %s4497_s1 = scalar_lea.vmem %s636_s9, 1024  ;;  %p4505_p13 = scmp.lt.s32.totalorder %s636_s9, %s636_s9 }
 0x194   : > { %p4498_p10 = scmp.ne.s32.totalorder %s636_s9, %s4497_s1  ;;  %p4506_p0 = scmp.lt.s32.totalorder %s4497_s1, %s4497_s1 }
 0x196   : > { %p4500_p11 = pnand %p4498_p10, %p5013_p8  ;;  %p4507_p2 = por %p4506_p0, %p4505_p13 }
 0x198   : > { %p4501_p12 = pneg %p4500_p11 }
 0x19a   : > { %p4508_p5 = pnand %p4507_p2, %p4501_p12 }
 0x19c   : > { %4511 = shalt.err (!%p4508_p5)
}
 0x19d   : > { %3849 = dma.hbm_to_vmem [thread:$0]  (!%p4999_p6), %s5802_s10, 1024, %s636_s9, [#allocation25], %s5797_s29, %s5797_s29, %s5796_s28  }
 0x19e   : > { %s5803_s12 = sld [smem:[#allocation74_spill]] }
 0x1a4   : > { %s4512_s22 = scalar_lea.hbm %s5803_s12, 16 }
 0x1a5   : > { %p4513_p7 = scmp.ne.s32.totalorder %s5803_s12, %s4512_s22  ;;  %p4519_p1 = scmp.lt.u32.totalorder %s4512_s22, %s5803_s12 }
 0x1a7   : > { %p4515_p9 = pnand %p4513_p7, %p5013_p8 }
 0x1a9   : > { %p4516_p4 = pneg %p4515_p9 }
 0x1ab   : > { %p4521_p3 = pnand %p4519_p1, %p4516_p4 }
 0x1ad   : > { %4524 = shalt.err (!%p4521_p3)
}
 0x1ae   : > { %s4525_s3 = scalar_lea.vmem %s661_s27, 16  ;;  %s4532_s9 = scalar_lea.vmem %s661_s27, 32 }
 0x1af   : > { %p4526_p10 = scmp.ne.s32.totalorder %s661_s27, %s4525_s3  ;;  %p4533_p13 = scmp.lt.s32.totalorder %s661_s27, %s661_s27 }
 0x1b0   : > { %p4534_p0 = scmp.lt.s32.totalorder %s4532_s9, %s4525_s3 }
 0x1b1   : > { %p4528_p11 = pnand %p4526_p10, %p5013_p8 }
 0x1b2   : > { %p4535_p2 = por %p4534_p0, %p4533_p13 }
 0x1b3   : > { %p4529_p12 = pneg %p4528_p11 }
 0x1b5   : > { %p4536_p5 = pnand %p4535_p2, %p4529_p12 }
 0x1b7   : > { %4539 = shalt.err (!%p4536_p5)
}
 0x1b8   : > { %3855 = dma.hbm_to_vmem [thread:$0]  (!%p4999_p6), %s5803_s12, 16, %s661_s27, [#allocation28]  }
 0x1b9   : > { %s4841_s2 = smov [#allocation32]   ;;  %s4842_s30 = smov [#allocation35]  }
 0x1ba   : > { %s684_s25 = sshll.u32 %s4841_s2, 4  ;;  %s705_s22 = sshll.u32 %s4842_s30, 4  ;;  %s685_s25 = int_to_ptr.vmem [resolvable:$true] %s684_s25  ;;  %s706_s22 = int_to_ptr.vmem [resolvable:$true] %s705_s22 }
 0x1bb   : > { %s4540_s24 = scalar_lea.hbm %s5729_s14, 16 }
 0x1bc   : > { %p4541_p7 = scmp.ne.s32.totalorder %s5729_s14, %s4540_s24  ;;  %p4547_p1 = scmp.lt.u32.totalorder %s4540_s24, %s5729_s14 }
 0x1be   : > { %p4543_p9 = pnand %p4541_p7, %p5013_p8 }
 0x1c0   : > { %p4544_p4 = pneg %p4543_p9 }
 0x1c2   : > { %p4549_p3 = pnand %p4547_p1, %p4544_p4 }
 0x1c4   : > { %4552 = shalt.err (!%p4549_p3)
}
 0x1c5   : > { %s4553_s27 = scalar_lea.vmem %s685_s25, 16  ;;  %s4560_s26 = scalar_lea.vmem %s685_s25, 32 }
 0x1c6   : > { %p4554_p10 = scmp.ne.s32.totalorder %s685_s25, %s4553_s27  ;;  %p4561_p13 = scmp.lt.s32.totalorder %s685_s25, %s685_s25 }
 0x1c7   : > { %p4562_p0 = scmp.lt.s32.totalorder %s4560_s26, %s4553_s27 }
 0x1c8   : > { %p4556_p11 = pnand %p4554_p10, %p5013_p8 }
 0x1c9   : > { %p4563_p2 = por %p4562_p0, %p4561_p13 }
 0x1ca   : > { %p4557_p12 = pneg %p4556_p11 }
 0x1cc   : > { %p4564_p5 = pnand %p4563_p2, %p4557_p12 }
 0x1ce   : > { %4567 = shalt.err (!%p4564_p5)
}
 0x1cf   : > { %3861 = dma.hbm_to_vmem [thread:$0]  (!%p4999_p6), %s5729_s14, 16, %s685_s25, [#allocation31]  }
 0x1d0   : > { %s4568_s24 = scalar_lea.hbm %s5731_s16, 1024 }
 0x1d1   : > { %p4569_p7 = scmp.ne.s32.totalorder %s5731_s16, %s4568_s24  ;;  %p4575_p1 = scmp.lt.u32.totalorder %s4568_s24, %s5731_s16 }
 0x1d3   : > { %p4571_p9 = pnand %p4569_p7, %p5013_p8 }
 0x1d5   : > { %p4572_p4 = pneg %p4571_p9 }
 0x1d7   : > { %p4577_p3 = pnand %p4575_p1, %p4572_p4 }
 0x1d9   : > { %4580 = shalt.err (!%p4577_p3)
}
 0x1da   : > { %s4581_s27 = scalar_lea.vmem %s706_s22, 1024  ;;  %p4589_p13 = scmp.lt.s32.totalorder %s706_s22, %s706_s22 }
 0x1db   : > { %p4582_p10 = scmp.ne.s32.totalorder %s706_s22, %s4581_s27  ;;  %p4590_p0 = scmp.lt.s32.totalorder %s4581_s27, %s4581_s27 }
 0x1dd   : > { %p4584_p11 = pnand %p4582_p10, %p5013_p8  ;;  %p4591_p2 = por %p4590_p0, %p4589_p13 }
 0x1df   : > { %p4585_p12 = pneg %p4584_p11 }
 0x1e1   : > { %p4592_p5 = pnand %p4591_p2, %p4585_p12 }
 0x1e3   : > { %4595 = shalt.err (!%p4592_p5)
}
 0x1e4   : > { %3867 = dma.hbm_to_vmem [thread:$0]  (!%p4999_p6), %s5731_s16, 1024, %s706_s22, [#allocation34], %s5797_s29, %s5797_s29, %s5796_s28  }
 0x1e5   : > { %s4843_s2 = smov [#allocation38]   ;;  %s4844_s0 = smov [#allocation41]  }
 0x1e6   : > { %s730_s30 = sshll.u32 %s4843_s2, 4  ;;  %s754_s7 = sshll.u32 %s4844_s0, 4  ;;  %s731_s30 = int_to_ptr.vmem [resolvable:$true] %s730_s30  ;;  %s755_s7 = int_to_ptr.vmem [resolvable:$true] %s754_s7 }
 0x1e7   : > { %s4596_s3 = scalar_lea.hbm %s5733_s18, 16 }
 0x1e8   : > { %p4597_p7 = scmp.ne.s32.totalorder %s5733_s18, %s4596_s3  ;;  %p4603_p1 = scmp.lt.u32.totalorder %s4596_s3, %s5733_s18 }
 0x1ea   : > { %p4599_p9 = pnand %p4597_p7, %p5013_p8 }
 0x1ec   : > { %p4600_p4 = pneg %p4599_p9 }
 0x1ee   : > { %p4605_p3 = pnand %p4603_p1, %p4600_p4 }
 0x1f0   : > { %4608 = shalt.err (!%p4605_p3)
}
 0x1f1   : > { %s4609_s28 = scalar_lea.vmem %s731_s30, 16  ;;  %s4616_s29 = scalar_lea.vmem %s731_s30, 32 }
 0x1f2   : > { %p4610_p10 = scmp.ne.s32.totalorder %s731_s30, %s4609_s28  ;;  %p4617_p13 = scmp.lt.s32.totalorder %s731_s30, %s731_s30 }
 0x1f3   : > { %p4618_p0 = scmp.lt.s32.totalorder %s4616_s29, %s4609_s28 }
 0x1f4   : > { %p4612_p11 = pnand %p4610_p10, %p5013_p8 }
 0x1f5   : > { %p4619_p2 = por %p4618_p0, %p4617_p13 }
 0x1f6   : > { %p4613_p12 = pneg %p4612_p11 }
 0x1f8   : > { %p4620_p5 = pnand %p4619_p2, %p4613_p12 }
 0x1fa   : > { %4623 = shalt.err (!%p4620_p5)
}
 0x1fb   : > { %3873 = dma.hbm_to_vmem [thread:$0]  (!%p4999_p6), %s5733_s18, 16, %s731_s30, [#allocation37]  }
 0x1fc   : > { %s4624_s24 = scalar_lea.hbm %s5735_s20, 16 }
 0x1fd   : > { %p4625_p7 = scmp.ne.s32.totalorder %s5735_s20, %s4624_s24  ;;  %p4631_p1 = scmp.lt.u32.totalorder %s4624_s24, %s5735_s20 }
 0x1ff   : > { %p4627_p9 = pnand %p4625_p7, %p5013_p8 }
 0x201   : > { %p4628_p4 = pneg %p4627_p9 }
 0x203   : > { %p4633_p3 = pnand %p4631_p1, %p4628_p4 }
 0x205   : > { %4636 = shalt.err (!%p4633_p3)
}
 0x206   : > { %s4637_s27 = scalar_lea.vmem %s755_s7, 16  ;;  %s4644_s30 = scalar_lea.vmem %s755_s7, 32 }
 0x207   : > { %p4638_p10 = scmp.ne.s32.totalorder %s755_s7, %s4637_s27  ;;  %p4645_p13 = scmp.lt.s32.totalorder %s755_s7, %s755_s7 }
 0x208   : > { %p4646_p0 = scmp.lt.s32.totalorder %s4644_s30, %s4637_s27 }
 0x209   : > { %p4640_p11 = pnand %p4638_p10, %p5013_p8 }
 0x20a   : > { %p4647_p2 = por %p4646_p0, %p4645_p13 }
 0x20b   : > { %p4641_p12 = pneg %p4640_p11 }
 0x20d   : > { %p4648_p5 = pnand %p4647_p2, %p4641_p12 }
 0x20f   : > { %4651 = shalt.err (!%p4648_p5)
}
 0x210   : > { %s5804_s29 = sld [smem:[#allocation59_spill]]  ;;  %s5805_s22 = sld [smem:[#allocation58_spill]] }
 0x211   : > { %s5806_s26 = sld [smem:[#allocation57_spill]]  ;;  %s5807_s4 = sld [smem:[#allocation56_spill]] }
 0x212   : > { %s5808_s2 = sld [smem:[#allocation60_spill]] }
 0x213   : > { %3879 = dma.hbm_to_vmem [thread:$0]  (!%p4999_p6), %s5735_s20, 16, %s755_s7, [#allocation40]  }
 0x216   : > { %s3233_s0 = sadd.s32 4294967294, %s5804_s29   ;;  %s5384_s27 = sadd.s32 1, %s5804_s29  }
 0x217   : > { %s56_s23 = sadd.s32 1, %s5805_s22  ;;  %s53_s24 = ssub.s32 %s5804_s29, %s5384_s27 }
 0x218   : > { %p63_p8 = scmp.ne.s32.totalorder %s5805_s22, %s5806_s26  ;;  %p54_p7 = scmp.eq.s32.totalorder %s53_s24, 0 }
 0x219   : > { %p64_p9 = scmp.eq.s32.totalorder %s5804_s29, 0  ;;  %p69_p4 = scmp.ne.s32.totalorder %s5806_s26, %s5807_s4 }
 0x21a   : > { %p518_p1 = scmp.eq.s32.totalorder %s5808_s2, 1  ;;  %p5809_p10 = scmp.eq.s32.totalorder %s5808_s2, 0 }
 0x21b   : > { %s5396_s21 = scalar_select %p54_p7, %s5805_s22, %s56_s23  }
 0x21c   : > { %p65_p3 = por %p64_p9, %p63_p8  ;;  %p5400_p11 = por %p5809_p10, %p69_p4 }
 0x21d   : > { %p5404_p6 = por %p518_p1, %p63_p8  ;;  %p524_p12 = scmp.eq.s32.totalorder %s3233_s0, 1 }
 0x21e   : > { %p3910_p13 = scmp.lt.s32.totalorder %s5804_s29, 2  ;;  %s765_s9 = sand.u32 1, %s5805_s22  }
 0x21f   : > { %s5811_s3 = scalar_select %p5404_p6, 1, 0 }
 0x220   : > { %p5410_p0 = por %p524_p12, %p69_p4  ;;  %s5414_s30 = sshll.u32 %s765_s9, 5 }
 0x221   : > { %s5762_s25 = sshll.u32 %s5804_s29, 9  ;;  %s5813_s4 = sld [smem:[#allocation62_spill]] }
 0x222   : > { %s5812_s1 = scalar_select %p5410_p0, 1, 0 }
 0x223   : > { %s769_s0 = scalar_lea.vmem [#allocation9], %s5414_s30  ;;  %p5425_p2 = pnand %p3910_p13, %p65_p3 }
 0x224   : > { %s776_s22 = sshll.u32 %s769_s0, 4  ;;  %s5431_s24 = scalar_lea.sflag [#allocation10], %s765_s9  ;;  %s5429_s22 = int_to_ptr.vmem [resolvable:$true] %s776_s22 }
 0x225   : > { %p4654_p8 = pneg %p5425_p2 }
 0x227   : > { %s5422_s2 = scalar_lea.hbm %s5813_s4, %s5762_s25  ;;  %s4657_s0 = scalar_lea.hbm %s5813_s4, 1024 }
 0x228   : > { %s4652_s5 = scalar_lea.hbm %s5422_s2, 512  ;;  %p4658_p4 = scmp.lt.u32.totalorder %s5422_s2, %s5813_s4 }
 0x229   : > { %p4653_p5 = scmp.ne.s32.totalorder %s5422_s2, %s4652_s5  ;;  %p4659_p1 = scmp.lt.u32.totalorder %s4657_s0, %s4652_s5 }
 0x22a   : > { %p4661_p10 = scmp.lt.u32.totalorder %s4652_s5, %s5422_s2 }
 0x22b   : > { %p4655_p7 = pnand %p4654_p8, %p4653_p5  ;;  %p4660_p3 = por %p4659_p1, %p4658_p4 }
 0x22d   : > { %p4656_p9 = pneg %p4655_p7  ;;  %p4662_p12 = por %p4661_p10, %p4660_p3 }
 0x22f   : > { %p4663_p13 = pnand %p4662_p12, %p4656_p9 }
 0x231   : > { %4666 = shalt.err (!%p4663_p13)
}
 0x232   : > { %s4667_s9 = scalar_lea.vmem %s5429_s22, 512  ;;  %s4845_s28 = smov [#allocation9]  }
 0x233   : > { %p4668_p5 = scmp.ne.s32.totalorder %s5429_s22, %s4667_s9  ;;  %s4672_s26 = sshll.u32 %s4845_s28, 4  ;;  %s4673_s26 = int_to_ptr.vmem [resolvable:$false] %s4672_s26 }
 0x234   : > { %s4674_s6 = scalar_lea.vmem %s4673_s26, 1024  ;;  %p4675_p6 = scmp.lt.s32.totalorder %s5429_s22, %s4673_s26 }
 0x235   : > { %p4670_p7 = pnand %p4668_p5, %p4654_p8  ;;  %p4676_p4 = scmp.lt.s32.totalorder %s4674_s6, %s4667_s9 }
 0x237   : > { %p4671_p0 = pneg %p4670_p7  ;;  %p4677_p1 = por %p4676_p4, %p4675_p6 }
 0x239   : > { %p4678_p3 = pnand %p4677_p1, %p4671_p0 }
 0x23b   : > { %4681 = shalt.err (!%p4678_p3)
}
 0x23c   : > { %s4846_s5 = smov 128   ;;  %s4847_s25 = smov 8  }
 0x23d   : > { %3883 = dma.hbm_to_vmem [thread:$0]  (!%p5425_p2), %s5422_s2, 512, %s5429_s22, %s5431_s24, %s4846_s5, %s4846_s5, %s4847_s25  }
 0x23e   : > { %s5815_s0 = sshll.u32 %s5804_s29, 9  ;;  %s5816_s26 = sld [smem:[#allocation63_spill]] }
 0x23f   : > { %s790_s8 = scalar_lea.vmem [#allocation12], %s5414_s30  ;;  %s786_s11 = sand.u32 1, %s5804_s29  }
 0x240   : > { %s797_s10 = sshll.u32 %s790_s8, 4  ;;  %s5473_s12 = scalar_lea.sflag [#allocation13], %s786_s11  ;;  %s5471_s10 = int_to_ptr.vmem [resolvable:$true] %s797_s10 }
 0x244   : > { %s5817_s6 = smov %s5816_s26  ;;  %s5467_s4 = scalar_lea.hbm %s5816_s26, %s5815_s0 }
 0x245   : > { %s4682_s13 = scalar_lea.hbm %s5467_s4, 512  ;;  %s4687_s24 = scalar_lea.hbm %s5817_s6, 1024 }
 0x246   : > { %p4683_p6 = scmp.ne.s32.totalorder %s5467_s4, %s4682_s13  ;;  %p4688_p10 = scmp.lt.u32.totalorder %s5467_s4, %s5817_s6 }
 0x247   : > { %p4689_p12 = scmp.lt.u32.totalorder %s4687_s24, %s4682_s13  ;;  %p4691_p5 = scmp.lt.u32.totalorder %s4682_s13, %s5467_s4 }
 0x248   : > { %p4685_p0 = pnand %p4683_p6, %p4654_p8 }
 0x249   : > { %p4690_p13 = por %p4689_p12, %p4688_p10 }
 0x24a   : > { %p4686_p9 = pneg %p4685_p0 }
 0x24b   : > { %p4692_p7 = por %p4691_p5, %p4690_p13 }
 0x24d   : > { %p4693_p4 = pnand %p4692_p7, %p4686_p9 }
 0x24f   : > { %4696 = shalt.err (!%p4693_p4)
}
 0x250   : > { %s4697_s8 = scalar_lea.vmem %s5471_s10, 512  ;;  %s4848_s11 = smov [#allocation12]  }
 0x251   : > { %p4698_p1 = scmp.ne.s32.totalorder %s5471_s10, %s4697_s8  ;;  %s4702_s29 = sshll.u32 %s4848_s11, 4  ;;  %s4703_s29 = int_to_ptr.vmem [resolvable:$false] %s4702_s29 }
 0x252   : > { %s4704_s30 = scalar_lea.vmem %s4703_s29, 1024  ;;  %p4705_p0 = scmp.lt.s32.totalorder %s5471_s10, %s4703_s29 }
 0x253   : > { %p4700_p3 = pnand %p4698_p1, %p4654_p8  ;;  %p4706_p10 = scmp.lt.s32.totalorder %s4704_s30, %s4697_s8 }
 0x255   : > { %p4701_p6 = pneg %p4700_p3  ;;  %p4707_p12 = por %p4706_p10, %p4705_p0 }
 0x257   : > { %p4708_p13 = pnand %p4707_p12, %p4701_p6 }
 0x259   : > { %4711 = shalt.err (!%p4708_p13)
}
 0x25a   : > { %3886 = dma.hbm_to_vmem [thread:$0]  (!%p5425_p2), %s5467_s4, 512, %s5471_s10, %s5473_s12, %s4846_s5, %s4846_s5, %s4847_s25  }
 0x25b   : > { %s5818_s13 = sld [smem:[#allocation61_spill]] }
 0x261   : > { %p5819_p8 = scmp.ne.s32.totalorder %s5818_s13, 0 }
 0x262   : > { %s5820_s28 = sld [smem:[#allocation57_spill]] (!%p5819_p8) }
 0x263   : > { %809 = sbr.rel (%p5819_p8) target bundleno = 2424 (0x978), region = 104 }
 0x268   : > { %s5505_s26 = sand.u32 (!%p5819_p8), 1, %s5820_s28  }
 0x269   : > { %s3262_s2 = sshll.u32 (!%p5819_p8), %s5505_s26, 5  ;;  %s812_s22 = scalar_lea.sflag (!%p5819_p8), [#allocation10], %s5505_s26 }
 0x26a   : > { %s5509_s24 = scalar_lea.vmem [#allocation9], %s3262_s2 }
 0x26b   : > { %4757 = dma.done.wait (%p5400_p11), %s812_s22, 512  }
 0x26c   : > { %4759 = vsyncadd (%p5400_p11), %s812_s22, 4294966784  ;;  %s5821_s23 = sld [smem:[#allocation60_spill]]  ;;  %s824_s4 = scalar_lea.vmem [#allocation12], %s3262_s2 }
 0x272   : > { %s820_s10 = sand.u32 1, %s5821_s23  }
 0x273   : > { %s821_s12 = scalar_lea.sflag [#allocation13], %s820_s10 }
 0x274   : > { %4761 = dma.done.wait (%p5400_p11), %s821_s12, 512  }
 0x275   : > { %4763 = vsyncadd (%p5400_p11), %s821_s12, 4294966784  ;;  %p5822_p2 = scmp.eq.s32.totalorder %s5821_s23, 0 }
 0x277   : > { %4765 = dma.done.wait (%p5822_p2), [#allocation13], 64   ;;  %p5823_p9 = pmov %p5822_p2 }
 0x278   : > { %p5824_p5 = pmov %p5822_p2 }
 0x279   : > { %4767 = vsyncadd (%p5823_p9), [#allocation13], 4294967232 }
 0x27a   : > { %4769 = dma.done.wait (%p5824_p5), [#allocation16], 3200   ;;  %p5825_p7 = pmov %p5822_p2 }
 0x27b   : > { %p5826_p4 = pmov %p5822_p2 }
 0x27c   : > { %4771 = vsyncadd (%p5825_p7), [#allocation16], 4294964096 }
 0x27d   : > { %4773 = dma.done.wait (%p5826_p4), [#allocation19], 32   ;;  %p5827_p1 = pmov %p5822_p2 }
 0x27f   : > { %4775 = vsyncadd (%p5827_p1), [#allocation19], 4294967264  ;;  %p5828_p11 = pmov %p5827_p1 }
 0x280   : > { %p5829_p3 = pmov %p5827_p1 }
 0x281   : > { %4777 = dma.done.wait (%p5828_p11), [#allocation22], 3088  }
 0x282   : > { %4779 = vsyncadd (%p5829_p3), [#allocation22], 4294964208  ;;  %p5830_p6 = pmov %p5827_p1 }
 0x283   : > { %p5831_p0 = pmov %p5827_p1 }
 0x284   : > { %4781 = dma.done.wait (%p5830_p6), [#allocation25], 1040  }
 0x285   : > { %4783 = vsyncadd (%p5831_p0), [#allocation25], 4294966256  ;;  %p5832_p10 = pmov %p5831_p0 }
 0x286   : > { %p5833_p12 = pmov %p5831_p0 }
 0x287   : > { %4785 = dma.done.wait (%p5832_p10), [#allocation28], 32  }
 0x288   : > { %4787 = vsyncadd (%p5833_p12), [#allocation28], 4294967264  ;;  %p5834_p13 = pmov %p5831_p0 }
 0x289   : > { %p5835_p8 = pmov %p5831_p0 }
 0x28a   : > { %4789 = dma.done.wait (%p5834_p13), [#allocation31], 3088  }
 0x28b   : > { %4791 = vsyncadd (%p5835_p8), [#allocation31], 4294964208  ;;  %p5836_p2 = pmov %p5831_p0 }
 0x28c   : > { %p5837_p9 = pmov %p5831_p0 }
 0x28d   : > { %4793 = dma.done.wait (%p5836_p2), [#allocation34], 1040  }
 0x28e   : > { %4795 = vsyncadd (%p5837_p9), [#allocation34], 4294966256  ;;  %p5838_p5 = pmov %p5831_p0 }
 0x28f   : > { %p5839_p7 = pmov %p5831_p0 }
 0x290   : > { %4797 = dma.done.wait (%p5838_p5), [#allocation37], 32  }
 0x291   : > { %4799 = vsyncadd (%p5839_p7), [#allocation37], 4294967264  ;;  %p5840_p4 = pmov %p5831_p0 }
 0x292   : > { %p5841_p1 = pmov %p5831_p0 }
 0x293   : > { %4801 = dma.done.wait (%p5840_p4), [#allocation40], 1040  }
 0x294   : > { %4803 = vsyncadd (%p5841_p1), [#allocation40], 4294966256  ;;  %vm1026_vm0 = vcmask 1043456   ;;  %vm969_vm1 = vcmask 31744   ;;  %v1013_v0 = vld [vmem:[#allocation14] sm:$0xf] }
 0x295   : > { %v965_v1 = vld [vmem:[%s824_s4] sm:$0xff]  ;;  %v966_v2 = vld [vmem:[%s824_s4 + $0x8] sm:$0xff]  ;;  %3604 = vmatprep.subr.msk.mxu1 %vm1026_vm0, %v1013_v0  ;;  %v967_v3 = vld [vmem:[%s824_s4 + $0x10] sm:$0xff]  ;;  %vm1120_vm2 = vcmask 64512   ;;  %vm1324_vm3 = vcmask 1042432   ;;  %vm1325_vm4 = vcmask 1046532  }
 0x296   : > { %v968_v4 = vld [vmem:[%s824_s4 + $0x18] sm:$0xff]  ;;  %v970_v5 = vsel %vm969_vm1, %v965_v1, -inf  ;;  %v971_v6 = vsel %vm969_vm1, %v966_v2, -inf  ;;  %v1119_v7 = vld [vmem:[#allocation15] sm:$0xff]  ;;  %3605 = vmatpush3.msk.msra.mxu1 %vm1026_vm0, %v1013_v0  ;;  %v972_v8 = vsel %vm969_vm1, %v967_v3, -inf  ;;  %v1117_v51 = vld [vmem:[%s5509_s24 + $0x10] sm:$0xff] }
 0x297   : > { %v973_v9 = vsel %vm969_vm1, %v968_v4, -inf  ;;  %v974_v10 = vmax.f32 %v970_v5, %v971_v6  ;;  %3612 = vmatprep.subr.mxu1 %v1119_v7  ;;  %v1115_v49 = vld [vmem:[%s5509_s24] sm:$0xff]  ;;  %v1116_v50 = vld [vmem:[%s5509_s24 + $0x8] sm:$0xff]  ;;  %v1118_v52 = vld [vmem:[%s5509_s24 + $0x18] sm:$0xff]  ;;  %vm1262_vm5 = vsmask.f32 3328 }
 0x298   : > { %v975_v11 = vmax.f32 %v972_v8, %v973_v9  ;;  %v3991_v53 = vld [vmem:[#allocation17 + $0x40] sm:$0xff]   ;;  %v3994_v56 = vld [vmem:[#allocation17 + $0x48] sm:$0xff]   ;;  %v3997_v59 = vld [vmem:[#allocation17 + $0x50] sm:$0xff]   ;;  %vm1263_vm6 = vsmask.f32 7440  ;;  %vm1787_vm9 = vcmask 1040384  }
 0x299   : > { %v3992_v54 = vld [vmem:[#allocation17] sm:$0xff]   ;;  %3469 = vmatprep.subr.bf16.mxu0 %v3991_v53  ;;  %v3995_v57 = vld [vmem:[#allocation17 + $0x8] sm:$0xff]   ;;  %v3998_v60 = vld [vmem:[#allocation17 + $0x10] sm:$0xff]   ;;  %vm1788_vm10 = vcmask 1044484   ;;  %vm1732_vm12 = vsmask.f32 2304 }
 0x29a   : > { %v976_v12 = vmax.f32 %v974_v10, %v975_v11  ;;  %3470 = vmatpush3.bf16.msra.mxu0 %v3992_v54  ;;  %v3990_v55 = vld [vmem:[#allocation17 + $0x80] sm:$0xff]   ;;  %v3993_v58 = vld [vmem:[#allocation17 + $0x88] sm:$0xff]   ;;  %v3996_v61 = vld [vmem:[#allocation17 + $0x90] sm:$0xff]   ;;  %vm1733_vm13 = vsmask.f32 6416  ;;  %vm4850_vm15 = vmmov 0  }
 0x29b   : > { %3471 = vmatprep.subr.bf16.mxu0 %v3994_v56  ;;  %v4000_v62 = vld [vmem:[#allocation17 + $0x58] sm:$0xff]   ;;  %v4007_v5 = vld [vmem:[#allocation17 + $0x28] sm:$0xff]   ;;  %v4009_v8 = vld [vmem:[#allocation17 + $0x70] sm:$0xff]   ;;  %s3283_s7 = sshll.u32 %s5505_s26, 3  ;;  %s3440_s5 = sshll.u32 %s5821_s23, 7 }
 0x29c   : > { %v977_v13 = vrot.slane %v976_v12, 4  ;;  %v4001_v63 = vld [vmem:[#allocation17 + $0x18] sm:$0xff]   ;;  %v4005_v6 = vld [vmem:[#allocation17 + $0xa8] sm:$0xff]   ;;  %v4010_v9 = vld [vmem:[#allocation17 + $0x30] sm:$0xff]   ;;  %s963_s25 = scalar_lea.vmem [#allocation42], %s3283_s7  ;;  %s5850_s11 = sld [smem:[#allocation76_spill]] }
 0x29d   : > { %v3999_v0 = vld [vmem:[#allocation17 + $0x98] sm:$0xff]   ;;  %vm5582_vm7 = vmor %vm1324_vm3, %vm1325_vm4  ;;  %s2960_s0 = sshll.u32 %s963_s25, 4  ;;  %s2947_s30 = scalar_lea.sflag [#allocation11], %s5505_s26  ;;  %s5673_s0 = int_to_ptr.vmem [resolvable:$true] %s2960_s0 }
 0x29e   : > { %v978_v14 = vmax.f32 %v976_v12, %v977_v13  ;;  %3472 = vmatpush3.bf16.msra.mxu0 %v3995_v57  ;;  %v4012_v10 = vld [vmem:[#allocation17 + $0x78] sm:$0xff]   ;;  %vm5588_vm8 = vmor %vm1262_vm5, %vm1263_vm6  ;;  %s4712_s13 = scalar_lea.vmem %s5673_s0, 128  ;;  %p5851_p3 = scmp.ne.s32.totalorder %s5811_s3, 0 }
 0x29f   : > { %3473 = vmatprep.subr.bf16.mxu0 %v3997_v59  ;;  %v4013_v11 = vld [vmem:[#allocation17 + $0x38] sm:$0xff]   ;;  %vm5607_vm11 = vmor %vm1787_vm9, %vm1788_vm10  ;;  %p4713_p11 = scmp.ne.s32.totalorder %s5673_s0, %s4712_s13  ;;  %s4851_s28 = smov [#allocation42]  }
 0x2a0   : > { %v979_v15 = vrot.slane %v978_v14, 2  ;;  %v4011_v12 = vld [vmem:[#allocation17 + $0xb8] sm:$0xff]   ;;  %vm5613_vm14 = vmor %vm1732_vm12, %vm1733_vm13  ;;  %s4716_s2 = sshll.u32 %s4851_s28, 4  ;;  %s4717_s2 = int_to_ptr.vmem [resolvable:$false] %s4716_s2 }
 0x2a1   : > { %p4714_p6 = pnand %p4713_p11, %p5851_p3  ;;  %s4718_s22 = scalar_lea.vmem %s4717_s2, 256 }
 0x2a2   : > { %v980_v16 = vmax.f32 %v978_v14, %v979_v15  ;;  %3474 = vmatpush3.bf16.msra.mxu0 %v3998_v60  ;;  %s5671_s29 = scalar_lea.hbm %s5850_s11, %s3440_s5  ;;  %p4719_p10 = scmp.lt.s32.totalorder %s5673_s0, %s4717_s2 }
 0x2a3   : > { %3475 = vmatprep.subr.bf16.mxu0 %v4000_v62  ;;  %p4715_p0 = pneg %p4714_p6  ;;  %p4720_p12 = scmp.lt.s32.totalorder %s4718_s22, %s4712_s13 }
 0x2a4   : > { %v981_v17 = vrot.slane %v980_v16, 1 }
 0x2a5   : > { %p4721_p13 = por %p4720_p12, %p4719_p10 }
 0x2a6   : > { %v982_v18 = vmax.f32 %v980_v16, %v981_v17  ;;  %3476 = vmatpush3.bf16.msra.mxu0 %v4001_v63 }
 0x2a7   : > { %p4722_p8 = pnand %p4721_p13, %p4715_p0 }
 0x2a8   : > { %v983_v19 = vsub.f32 %v965_v1, %v982_v18  ;;  %v984_v20 = vsub.f32 %v966_v2, %v982_v18  ;;  %v985_v21 = vsub.f32 %v967_v3, %v982_v18  ;;  %v986_v22 = vsub.f32 %v968_v4, %v982_v18  ;;  %v4003_v1 = vld [vmem:[#allocation17 + $0x60] sm:$0xff]   ;;  %v4006_v4 = vld [vmem:[#allocation17 + $0x68] sm:$0xff]  }
 0x2a9   : > { %v4004_v2 = vld [vmem:[#allocation17 + $0x20] sm:$0xff]   ;;  %3477 = vmatprep.subr.bf16.mxu0 %v4003_v1 }
 0x2aa   : > { %v987_v23 = vmul.f32 1.442695, %v983_v19  ;;  %v989_v24 = vmul.f32 1.442695, %v984_v20  ;;  %v991_v25 = vmul.f32 1.442695, %v985_v21  ;;  %3478 = vmatpush3.bf16.msra.mxu0 %v4004_v2 }
 0x2ab   : > { %v993_v26 = vmul.f32 1.442695, %v986_v22  ;;  %v4002_v3 = vld [vmem:[#allocation17 + $0xa0] sm:$0xff]   ;;  %3479 = vmatprep.subr.bf16.mxu0 %v4006_v4 }
 0x2ac   : > { %4106 = vpow2.f32 %v987_v23 }
 0x2ad   : > { %4108 = vpow2.f32 %v989_v24 }
 0x2ae   : > { %4110 = vpow2.f32 %v991_v25  ;;  %3480 = vmatpush3.bf16.msra.mxu0 %v4007_v5 }
 0x2af   : > { %4112 = vpow2.f32 %v993_v26  ;;  %3481 = vmatprep.subr.bf16.mxu0 %v4009_v8 }
 0x2b2   : > { %3482 = vmatpush3.bf16.msra.mxu0 %v4010_v9 }
 0x2b3   : > { %3483 = vmatprep.subr.bf16.mxu0 %v4012_v10 }
 0x2b6   : > { %v4107_v27 = vpop.eup %4106  ;;  %3484 = vmatpush3.bf16.msra.mxu0 %v4013_v11 }
 0x2b7   : > { %v4109_v28 = vpop.eup %4108  ;;  %v995_v29 = vsel %vm969_vm1, %v4107_v27, 0.0 }
 0x2b8   : > { %v4111_v30 = vpop.eup %4110  ;;  %v996_v31 = vsel %vm969_vm1, %v4109_v28, 0.0 }
 0x2b9   : > { %v4113_v32 = vpop.eup %4112  ;;  %v997_v33 = vadd.f32 %v996_v31, %v995_v29  ;;  %v998_v34 = vsel %vm969_vm1, %v4111_v30, 0.0 }
 0x2ba   : > { %v1000_v35 = vsel %vm969_vm1, %v4113_v32, 0.0 }
 0x2bb   : > { %v999_v36 = vadd.f32 %v998_v34, %v997_v33 }
 0x2bd   : > { %v1001_v37 = vadd.f32 %v1000_v35, %v999_v36 }
 0x2bf   : > { %v1002_v38 = vrot.slane %v1001_v37, 4 }
 0x2c1   : > { %v1003_v39 = vadd.f32 %v1002_v38, %v1001_v37 }
 0x2c3   : > { %v1004_v40 = vrot.slane %v1003_v39, 2 }
 0x2c5   : > { %v1005_v41 = vadd.f32 %v1004_v40, %v1003_v39 }
 0x2c7   : > { %v1006_v42 = vrot.slane %v1005_v41, 1 }
 0x2c9   : > { %v1007_v43 = vadd.f32 %v1006_v42, %v1005_v41 }
 0x2cb   : > { %4114 = vrcp.f32 %v1007_v43 }
 0x2d5   : > { %v4115_v44 = vpop.eup %4114 }
 0x2d6   : > { %v1009_v45 = vmul.f32 %v4115_v44, %v4107_v27  ;;  %v1010_v46 = vmul.f32 %v4115_v44, %v4109_v28  ;;  %v1011_v47 = vmul.f32 %v4115_v44, %v4111_v30  ;;  %v1012_v48 = vmul.f32 %v4115_v44, %v4113_v32 }
 0x2d8   : > { %3606 = vmatprep.mubr.msk.f32.mxu1 %vm969_vm1, %v1009_v45 }
 0x2d9   : > { %3607 = vmatmul.mubr.msk.f32.vlgmr.msra.gmra.mrb[0].mxu1 %vm969_vm1, %v1010_v46 }
 0x2da   : > { %3613 = vmatpush3.msra.mxu1 %v1119_v7  ;;  %3609 = vmatprep.mubr.msk.f32.mxu1 %vm969_vm1, %v1011_v47  ;;  %v4008_v7 = vld [vmem:[#allocation17 + $0xb0] sm:$0xff]  }
 0x2db   : > { %3620 = vmatprep.subr.bf16.mxu1 %v3990_v55 }
 0x2dd   : > { %3610 = vmatmul.mubr.msk.f32.gmra.mrb[2].mxu1 %vm969_vm1, %v1012_v48 }
 0x2de   : > { %3614 = vmatprep.mubr.msk.f32.mxu1 %vm1120_vm2, %v1115_v49 }
 0x2e1   : > { %3615 = vmatmul.mubr.msk.f32.vlgmr.msra.gmra.mrb[4].mxu1 %vm1120_vm2, %v1116_v50 }
 0x2e2   : > { %3617 = vmatprep.mubr.msk.f32.mxu1 %vm1120_vm2, %v1117_v51  ;;  %3621 = vmatpush3.bf16.msra.mxu1 %v3990_v55 }
 0x2e3   : > { %3622 = vmatprep.subr.bf16.mxu1 %v3993_v58 }
 0x2e5   : > { %3618 = vmatmul.mubr.msk.f32.gmra.mrb[6].mxu1 %vm1120_vm2, %v1118_v52 }
 0x2e6   : > { %3623 = vmatpush3.bf16.msra.mxu1 %v3993_v58 }
 0x2e7   : > { %3624 = vmatprep.subr.bf16.mxu1 %v3996_v61 }
 0x2ea   : > { %3625 = vmatpush3.bf16.msra.mxu1 %v3996_v61 }
 0x2eb   : > { %3626 = vmatprep.subr.bf16.mxu1 %v3999_v0 }
 0x2ee   : > { %3627 = vmatpush3.bf16.msra.mxu1 %v3999_v0 }
 0x2ef   : > { %3628 = vmatprep.subr.bf16.mxu1 %v4002_v3 }
 0x2f2   : > { %3629 = vmatpush3.bf16.msra.mxu1 %v4002_v3 }
 0x2f3   : > { %3630 = vmatprep.subr.bf16.mxu1 %v4005_v6 }
 0x2f6   : > { %3631 = vmatpush3.bf16.msra.mxu1 %v4005_v6 }
 0x2f7   : > { %3632 = vmatprep.subr.bf16.mxu1 %v4008_v7 }
 0x2fa   : > { %3633 = vmatpush3.bf16.msra.mxu1 %v4008_v7 }
 0x2fb   : > { %3634 = vmatprep.subr.bf16.mxu1 %v4011_v12 }
 0x2fe   : > { %3635 = vmatpush3.bf16.msra.mxu1 %v4011_v12 }
 0x3ac   : > { %v3608_v13 = vpop.f32.mrb[0].mxu1 }
 0x3ad   : > { %v1096_v14 = vpop.f32.mrb[1].mxu1 }
 0x3b0   : > { %v3611_v15 = vpop.f32.mrb[2].mxu1 }
 0x3b1   : > { %v1106_v16 = vpop.f32.mrb[3].mxu1 }
 0x3b4   : > { %v3616_v17 = vpop.f32.mrb[4].mxu1 }
 0x3b5   : > { %v1219_v18 = vmax.f32 %v3616_v17, 0.0  ;;  %v1199_v19 = vpop.f32.mrb[5].mxu1 }
 0x3b6   : > { %v1218_v20 = vmax.f32 %v1199_v19, 0.0 }
 0x3b7   : > { %v1223_v21 = vmul.f32 %v3608_v13, %v1219_v18 }
 0x3b8   : > { %v1222_v22 = vmul.f32 %v1218_v20, %v1096_v14  ;;  %v3619_v23 = vpop.f32.mrb[6].mxu1 }
 0x3b9   : > { %v1221_v24 = vmax.f32 %v3619_v23, 0.0  ;;  %v1209_v25 = vpop.f32.mrb[7].mxu1  ;;  %v4117_v30 = vpack.c.bf16 %v1223_v21, %v1223_v21  ;;  %v4025_v23 = vld [vmem:[#allocation21 + $0x40] sm:$0xff]  }
 0x3ba   : > { %v1226_v26 = vpack.c.bf16 %v1223_v21, %v1222_v22  ;;  %v1220_v27 = vmax.f32 %v1209_v25, 0.0  ;;  %v4116_v29 = vpack.c.bf16 %v1222_v22, %v1222_v22  ;;  %v4024_v22 = vld [vmem:[#allocation21 + $0x80] sm:$0xff]   ;;  %v4027_v25 = vld [vmem:[#allocation21 + $0x88] sm:$0xff]   ;;  %3507 = vmatprep.subr.bf16.mxu0 %v4025_v23 }
 0x3bb   : > { %v1225_v28 = vmul.f32 %v3611_v15, %v1221_v24  ;;  %1247 = vst [vmem:[#allocation3 + $0xc] sm:$0xf] %v4117_v30  ;;  %v1275_v35 = vshll.u32 %v4117_v30, 16  ;;  %v1279_v36 = vshrl.u32 %v4117_v30, 16  ;;  %3640 = vmatprep.subr.bf16.mxu1 %v4024_v22  ;;  %v4026_v24 = vld [vmem:[#allocation21] sm:$0xff]   ;;  %v4032_v30 = vld [vmem:[#allocation21 + $0x10] sm:$0xff]  }
 0x3bc   : > { %1228 = vst [vmem:[#allocation2] sm:$0xff] %v1226_v26  ;;  %v1224_v31 = vmul.f32 %v1220_v27, %v1106_v16  ;;  %1246 = vst [vmem:[#allocation3] sm:$0xf] %v4116_v29  ;;  %v1266_v33 = vshrl.u32 %v4116_v29, 16  ;;  %v1269_v34 = vshll.u32 %v4116_v29, 16  ;;  %v4028_v26 = vld [vmem:[#allocation21 + $0x48] sm:$0xff]  }
 0x3bd   : > { %v4119_v38 = vpack.c.bf16 %v1225_v28, %v1225_v28  ;;  %v1277_v41 = vrot.slane %v1275_v35, 5  ;;  %v1281_v42 = vrot.slane %v1279_v36, 4  ;;  %v4029_v27 = vld [vmem:[#allocation21 + $0x8] sm:$0xff]   ;;  %v4031_v29 = vld [vmem:[#allocation21 + $0x50] sm:$0xff]   ;;  %v4037_v35 = vld [vmem:[#allocation21 + $0x60] sm:$0xff]  }
 0x3be   : > { %v1227_v32 = vpack.c.bf16 %v1225_v28, %v1224_v31  ;;  %v4118_v37 = vpack.c.bf16 %v1224_v31, %v1224_v31  ;;  %v1268_v39 = vrot.slane %v1266_v33, 4  ;;  %v1271_v40 = vrot.slane %v1269_v34, 5  ;;  %v4030_v28 = vld [vmem:[#allocation21 + $0x90] sm:$0xff]   ;;  %v4033_v31 = vld [vmem:[#allocation21 + $0x98] sm:$0xff]   ;;  %v4036_v34 = vld [vmem:[#allocation21 + $0xa0] sm:$0xff]  }
 0x3bf   : > { %v1295_v44 = vshll.u32 %v4119_v38, 16  ;;  %v1299_v45 = vshrl.u32 %v4119_v38, 16  ;;  %v1335_v48 = vrot.slane %v4119_v38, 5  ;;  %v1282_v51 = vor.u32 %v1281_v42, %v1277_v41  ;;  %v4035_v33 = vld [vmem:[#allocation21 + $0x18] sm:$0xff]   ;;  %v4038_v36 = vld [vmem:[#allocation21 + $0x20] sm:$0xff]   ;;  %v4040_v38 = vld [vmem:[#allocation21 + $0x68] sm:$0xff]  }
 0x3c0   : > { %1229 = vst [vmem:[#allocation2 + $0x8] sm:$0xff] %v1227_v32  ;;  %v1289_v43 = vshrl.u32 %v4118_v37, 16  ;;  %v1332_v46 = vrot.slane %v4118_v37, 5  ;;  %v1272_v50 = vor.u32 %v1271_v40, %v1268_v39  ;;  %v1285_v52 = vshll.u32 %v4118_v37, 16  ;;  %v4034_v32 = vld [vmem:[#allocation21 + $0x58] sm:$0xff]   ;;  %v4039_v37 = vld [vmem:[#allocation21 + $0xa8] sm:$0xff]  }
 0x3c1   : > { %v1337_v58 = vrot.slane %v1335_v48, 4  ;;  %v1283_v60 = vrot.slane %v1282_v51, 4  ;;  %v1297_v1 = vrot.slane %v1295_v44, 5  ;;  %v1301_v6 = vrot.slane %v1299_v45, 4  ;;  %v4041_v39 = vld [vmem:[#allocation21 + $0x28] sm:$0xff]   ;;  %v4042_v40 = vld [vmem:[#allocation21 + $0xb0] sm:$0xff]  }
 0x3c2   : > { %v1291_v55 = vrot.slane %v1289_v43, 4  ;;  %v1334_v56 = vrot.slane %v1332_v46, 4  ;;  %v1273_v59 = vrot.slane %v1272_v50, 4  ;;  %v1287_v61 = vrot.slane %v1285_v52, 5  ;;  %v4045_v42 = vld [vmem:[#allocation21 + $0xb8] sm:$0xff]   ;;  %v4044_v43 = vld [vmem:[#allocation21 + $0x30] sm:$0xff]  }
 0x3c3   : > { %v1312_v47 = vld [vmem:[#allocation2] sm:$0xfe]  ;;  %1345 = vst [vmem:[#allocation3 + $0x2c] sm:$0x7] %v1337_v58  ;;  %v1302_v12 = vor.u32 %v1301_v6, %v1297_v1  ;;  %v4015_v16 = vld [vmem:[#allocation3] ss:$12 sps:$4 sm:$0xff]  }
 0x3c4   : > { %v3301_v53 = vcombine.low %v1312_v47, %v1312_v47  ;;  %v3302_v54 = vcombine.high %v1312_v47, %v1312_v47  ;;  %v1336_v0 = vsel %vm5582_vm7, %v1334_v56, %v1335_v48  ;;  %v1278_v3 = vsel %vm5588_vm8, %v1273_v59, %v1277_v41  ;;  %v4043_v41 = vld [vmem:[#allocation21 + $0x70] sm:$0xff]   ;;  %v4047_v44 = vld [vmem:[#allocation21 + $0x78] sm:$0xff]  }
 0x3c5   : > { %1344 = vst [vmem:[#allocation3 + $0x20] sm:$0xf] %v1336_v0  ;;  %v1288_v4 = vsel %vm5588_vm8, %v1283_v60, %v1287_v61  ;;  %v1292_v5 = vor.u32 %v1291_v55, %v1287_v61  ;;  %1308 = vst [vmem:[#allocation3 + $0x4] sm:$0xf] %v1278_v3  ;;  %v1303_v15 = vrot.slane %v1302_v12, 4  ;;  %v4048_v45 = vld [vmem:[#allocation21 + $0x38] sm:$0xff]  }
 0x3c6   : > { %v3305_v62 = vrot.slane %v3301_v53, 9  ;;  %v1329_v63 = vrot.slane %v3302_v54, 5  ;;  %1309 = vst [vmem:[#allocation3 + $0x10] sm:$0xf] %v1288_v4  ;;  %v3336_v53 = vld [vmem:[#allocation18] ss:$0 sm:$0xff] }
 0x3c7   : > { %v1231_v2 = vld [vmem:[#allocation2 + $0x8] sm:$0x7f]  ;;  %v1293_v11 = vrot.slane %v1292_v5, 4  ;;  %1311 = vst [vmem:[#allocation3 + $0x28] sm:$0x7] %v1303_v15 }
 0x3c8   : > { %v1331_v7 = vrot.slane %v1329_v63, 4  ;;  %v1330_v8 = vsel %vm5582_vm7, %v3305_v62, %v1329_v63  ;;  %v3295_v9 = vcombine.low %v1231_v2, %v1231_v2  ;;  %v3296_v10 = vcombine.high %v1231_v2, %v1231_v2  ;;  %v3337_v58 = vld [vmem:[#allocation20] ss:$0 sm:$0xff] }
 0x3c9   : > { %1342 = vst [vmem:[#allocation3 + $0x8] sm:$0xf] %v1330_v8  ;;  %v1298_v14 = vsel %vm5588_vm8, %v1293_v11, %v1297_v1 }
 0x3ca   : > { %v1333_v13 = vsel %vm5582_vm7, %v1331_v7, %v1332_v46  ;;  %1248 = vst [vmem:[#allocation3 + $0x18] sm:$0xf] %v3295_v9  ;;  %1249 = vst [vmem:[#allocation3 + $0x24] sm:$0x7] %v3296_v10  ;;  %v5604_v46 = vld [vmem:[#allocation26] sm:$0xff]  }
 0x3cb   : > { %1343 = vst [vmem:[#allocation3 + $0x14] sm:$0xf] %v1333_v13  ;;  %1310 = vst [vmem:[#allocation3 + $0x1c] sm:$0xf] %v1298_v14 }
 0x3cc   : > { %v4018_v19 = vld [vmem:[#allocation3 + $0x20] ss:$12 sps:$4 sm:$0x7f]  }
 0x3cd   : > { %v4017_v17 = vld [vmem:[#allocation3 + $0x4] ss:$12 sps:$4 sm:$0xff]  }
 0x3ce   : > { %1610 = vmatprep.mubr.bf16.mxu0 %v4017_v17 }
 0x3cf   : > { %1611 = vmatmul.mubr.bf16.vlgmr.msra.gmra.mrb[0].mxu0 %v4015_v16 }
 0x3d0   : > { %3508 = vmatpush3.bf16.msra.mxu0 %v4026_v24 }
 0x3d1   : > { %v4023_v21 = vld [vmem:[#allocation3 + $0x18] ss:$12 sps:$4 sm:$0x7f]   ;;  %3509 = vmatprep.subr.bf16.mxu0 %v4028_v26 }
 0x3d2   : > { %v4014_v18 = vld [vmem:[#allocation3 + $0x8] ss:$12 sps:$4 sm:$0xff]  }
 0x3d3   : > { %3636 = vmatprep.mubr.bf16.mxu1 %v4014_v18  ;;  %v4021_v20 = vld [vmem:[#allocation3 + $0x1c] ss:$12 sps:$4 sm:$0x7f]  }
 0x3d4   : > { %3637 = vmatmul.mubr.bf16.vlgmr.msra.gmra.mrb[8].mxu1 %v4018_v19  ;;  %1618 = vmatprep.mubr.bf16.mxu0 %v4021_v20 }
 0x3d5   : > { %3641 = vmatpush3.bf16.msra.mxu1 %v4024_v22  ;;  %3510 = vmatpush3.bf16.msra.mxu0 %v4029_v27 }
 0x3d6   : > { %3642 = vmatprep.subr.bf16.mxu1 %v4027_v25  ;;  %3511 = vmatprep.subr.bf16.mxu0 %v4031_v29 }
 0x3d7   : > { %1619 = vmatmul.mubr.bf16.gmra.mrb[4].mxu0 %v4023_v21 }
 0x3d9   : > { %3643 = vmatpush3.bf16.msra.mxu1 %v4027_v25  ;;  %3512 = vmatpush3.bf16.msra.mxu0 %v4032_v30 }
 0x3da   : > { %3644 = vmatprep.subr.bf16.mxu1 %v4030_v28  ;;  %3513 = vmatprep.subr.bf16.mxu0 %v4034_v32 }
 0x3dd   : > { %3645 = vmatpush3.bf16.msra.mxu1 %v4030_v28  ;;  %3514 = vmatpush3.bf16.msra.mxu0 %v4035_v33 }
 0x3de   : > { %3646 = vmatprep.subr.bf16.mxu1 %v4033_v31  ;;  %3515 = vmatprep.subr.bf16.mxu0 %v4037_v35 }
 0x3e1   : > { %3647 = vmatpush3.bf16.msra.mxu1 %v4033_v31  ;;  %3516 = vmatpush3.bf16.msra.mxu0 %v4038_v36 }
 0x3e2   : > { %3648 = vmatprep.subr.bf16.mxu1 %v4036_v34  ;;  %3517 = vmatprep.subr.bf16.mxu0 %v4040_v38 }
 0x3e5   : > { %3649 = vmatpush3.bf16.msra.mxu1 %v4036_v34  ;;  %3518 = vmatpush3.bf16.msra.mxu0 %v4041_v39 }
 0x3e6   : > { %3650 = vmatprep.subr.bf16.mxu1 %v4039_v37  ;;  %3519 = vmatprep.subr.bf16.mxu0 %v4043_v41 }
 0x3e9   : > { %3651 = vmatpush3.bf16.msra.mxu1 %v4039_v37  ;;  %3520 = vmatpush3.bf16.msra.mxu0 %v4044_v43 }
 0x3ea   : > { %3652 = vmatprep.subr.bf16.mxu1 %v4042_v40  ;;  %3521 = vmatprep.subr.bf16.mxu0 %v4047_v44 }
 0x3ed   : > { %3653 = vmatpush3.bf16.msra.mxu1 %v4042_v40  ;;  %3522 = vmatpush3.bf16.msra.mxu0 %v4048_v45 }
 0x3ee   : > { %3654 = vmatprep.subr.bf16.mxu1 %v4045_v42  ;;  %3660 = vmatprep.subr.bf16.mxu0 %v5604_v46 }
 0x3f1   : > { %3655 = vmatpush3.bf16.msra.mxu1 %v4045_v42 }
 0x4a2   : > { %v3485_v47 = vpop.f32.mrb[0].mxu0 }
 0x4a3   : > { %v3486_v48 = vpop.f32.mrb[1].mxu0 }
 0x4a4   : > { %v3487_v50 = vadd.f32 %v3486_v48, %v3485_v47  ;;  %v3488_v51 = vpop.f32.mrb[2].mxu0 }
 0x4a5   : > { %v3489_v54 = vpop.f32.mrb[3].mxu0 }
 0x4a6   : > { %v3490_v57 = vadd.f32 %v3489_v54, %v3488_v51 }
 0x4a7   : > { %v3638_v49 = vpop.f32.mrb[8].mxu1 }
 0x4a8   : > { %v1661_v52 = vpop.f32.mrb[9].mxu1 }
 0x4a9   : > { %v1662_v55 = vadd.f32 %v3487_v50, %v1661_v52  ;;  %v3639_v56 = vpop.f32.mrb[10].mxu1 }
 0x4aa   : > { %v1664_v59 = vpop.f32.mrb[11].mxu1  ;;  %v3491_v0 = vpop.f32.mrb[4].mxu0 }
 0x4ab   : > { %v1683_v60 = vmul.f32 %v3336_v53, %v1662_v55  ;;  %v1665_v61 = vadd.f32 %v3490_v57, %v1664_v59  ;;  %v3492_v1 = vpop.f32.mrb[5].mxu0 }
 0x4ac   : > { %v3493_v3 = vadd.f32 %v3492_v1, %v3491_v0  ;;  %v3494_v4 = vpop.f32.mrb[6].mxu0 }
 0x4ad   : > { %v1694_v62 = vadd.f32 %v3337_v58, %v1683_v60  ;;  %v1684_v63 = vmul.f32 %v3336_v53, %v1665_v61  ;;  %v3495_v5 = vpop.f32.mrb[7].mxu0 }
 0x4ae   : > { %v1670_v8 = vadd.f32 %v3638_v49, %v3493_v3  ;;  %v3496_v9 = vadd.f32 %v3495_v5, %v3494_v4 }
 0x4af   : > { %v1695_v2 = vadd.f32 %v3337_v58, %v1684_v63  ;;  %v1698_v6 = vmax.f32 %v1694_v62, 0.0 }
 0x4b0   : > { %v1685_v11 = vmul.f32 %v3336_v53, %v1670_v8  ;;  %v1673_v12 = vadd.f32 %v3639_v56, %v3496_v9  ;;  %v4056_v9 = vld [vmem:[#allocation26 + $0x8] sm:$0xff]  }
 0x4b1   : > { %v1699_v7 = vmax.f32 %v1695_v2, 0.0 }
 0x4b2   : > { %v1696_v13 = vadd.f32 %v3337_v58, %v1685_v11  ;;  %v1686_v14 = vmul.f32 %v3336_v53, %v1673_v12 }
 0x4b3   : > { %v3457_v10 = vpack.c.bf16 %v1699_v7, %v1698_v6 }
 0x4b4   : > { %v1700_v15 = vmax.f32 %v1696_v13, 0.0  ;;  %v1697_v16 = vadd.f32 %v3337_v58, %v1686_v14  ;;  %v4057_v13 = vld [vmem:[#allocation26 + $0x10] sm:$0xff]   ;;  %v4058_v14 = vld [vmem:[#allocation26 + $0x18] sm:$0xff]  }
 0x4b5   : > { %3458 = vst [vmem:[#allocation4] sm:$0xff] %v3457_v10  }
 0x4b6   : > { %v3447_v17 = vpack.c.bf16 %v1700_v15, %v1700_v15  ;;  %v1701_v18 = vmax.f32 %v1697_v16, 0.0  ;;  %v4059_v15 = vld [vmem:[#allocation26 + $0x20] sm:$0xff]   ;;  %v4060_v16 = vld [vmem:[#allocation26 + $0x28] sm:$0xff]  }
 0x4b8   : > { %1720 = vst [vmem:[#allocation4 + $0x8] sm:$0xf] %v3447_v17  ;;  %v3448_v19 = vpack.c.bf16 %v1701_v18, %v1701_v18  ;;  %v4061_v17 = vld [vmem:[#allocation26 + $0x30] sm:$0xff]  }
 0x4ba   : > { %1721 = vst [vmem:[#allocation4 + $0xc] sm:$0x7] %v3448_v19 }
 0x4bc   : > { %v1728_v20 = vld [vmem:[#allocation4] sm:$0xe]  ;;  %v1729_v21 = vld [vmem:[#allocation4 + $0x4] sm:$0xf] }
 0x4bd   : > { %v1779_v22 = vld [vmem:[#allocation4] sm:$0x8]  ;;  %v1736_v23 = vshrl.u32 %v1728_v20, 16  ;;  %v1739_v24 = vshll.u32 %v1728_v20, 16  ;;  %v1745_v25 = vshrl.u32 %v1729_v21, 16  ;;  %v1748_v26 = vshll.u32 %v1729_v21, 16 }
 0x4be   : > { %v1780_v27 = vld [vmem:[#allocation4 + $0x4] sm:$0xf]  ;;  %v3342_v29 = vrot.slane %v1779_v22, 11  ;;  %v1722_v31 = vld [vmem:[#allocation4] sm:$0xf] }
 0x4bf   : > { %v1792_v30 = vrot.slane %v1780_v27, 7  ;;  %v1723_v32 = vld [vmem:[#allocation4 + $0x4] sm:$0xf]  ;;  %v1738_v33 = vrot.slane %v1736_v23, 5  ;;  %v1741_v34 = vrot.slane %v1739_v24, 6  ;;  %v1747_v35 = vrot.slane %v1745_v25, 5 }
 0x4c0   : > { %1725 = vst [vmem:[#allocation5] sm:$0xf] %v1722_v31  ;;  %1726 = vst [vmem:[#allocation5 + $0xc] sm:$0xf] %v1723_v32  ;;  %v1750_v36 = vrot.slane %v1748_v26, 6 }
 0x4c1   : > { %v1793_v37 = vsel %vm5607_vm11, %v3342_v29, %v1792_v30  ;;  %v1742_v38 = vor.u32 %v1741_v34, %v1738_v33  ;;  %v1730_v39 = vld [vmem:[#allocation4 + $0x8] sm:$0xf]  ;;  %v1731_v49 = vld [vmem:[#allocation4 + $0xc] sm:$0x3]  ;;  %v1794_v51 = vrot.slane %v1792_v30, 4 }
 0x4c2   : > { %1803 = vst [vmem:[#allocation5 + $0x8] sm:$0xf] %v1793_v37  ;;  %v1781_v40 = vld [vmem:[#allocation4 + $0x8] sm:$0xf]  ;;  %v1751_v41 = vor.u32 %v1750_v36, %v1747_v35  ;;  %v1755_v43 = vshrl.u32 %v1730_v39, 16  ;;  %v1758_v44 = vshll.u32 %v1730_v39, 16 }
 0x4c3   : > { %v1724_v42 = vld [vmem:[#allocation4 + $0x8] sm:$0xf]  ;;  %v1795_v45 = vrot.slane %v1781_v40, 7  ;;  %v1743_v48 = vrot.slane %v1742_v38, 4  ;;  %v1782_v50 = vld [vmem:[#allocation4 + $0xc] sm:$0x7] }
 0x4c4   : > { %1727 = vst [vmem:[#allocation5 + $0x18] sm:$0xf] %v1724_v42  ;;  %v1757_v52 = vrot.slane %v1755_v43, 5  ;;  %v1760_v53 = vrot.slane %v1758_v44, 6  ;;  %v1765_v55 = vshrl.u32 %v1731_v49, 16  ;;  %v1768_v56 = vshll.u32 %v1731_v49, 16 }
 0x4c5   : > { %v1797_v54 = vrot.slane %v1795_v45, 4  ;;  %v1798_v57 = vrot.slane %v1782_v50, 7  ;;  %v1796_v58 = vsel %vm5607_vm11, %v1794_v51, %v1795_v45  ;;  %v1752_v59 = vsel %vm5613_vm14, %v1743_v48, %v1751_v41  ;;  %v3373_v26 = vld [vmem:[#allocation23] ss:$0 sm:$0xff]  ;;  %v3374_v30 = vld [vmem:[#allocation24] ss:$0 sm:$0xff] }
 0x4c6   : > { %v1767_v60 = vrot.slane %v1765_v55, 5  ;;  %1804 = vst [vmem:[#allocation5 + $0x14] sm:$0xf] %v1796_v58  ;;  %v1753_v61 = vrot.slane %v1751_v41, 4  ;;  %v1761_v62 = vor.u32 %v1760_v53, %v1757_v52  ;;  %1776 = vst [vmem:[#allocation5 + $0x4] sm:$0xf] %v1752_v59 }
 0x4c7   : > { %v1770_v63 = vrot.slane %v1768_v56, 6  ;;  %v1799_v0 = vsel %vm5607_vm11, %v1797_v54, %v1798_v57  ;;  %v4050_v7 = vld [vmem:[#allocation5] ss:$12 sps:$4 sm:$0xff]   ;;  %v4063_v51 = vld [vmem:[#allocation30 + $0x80] sm:$0xff]   ;;  %v4849_v52 = vmov 0.0   ;;  %v4070_v59 = vld [vmem:[#allocation30 + $0x98] sm:$0xff]  }
 0x4c8   : > { %1805 = vst [vmem:[#allocation5 + $0x20] sm:$0xf] %v1799_v0  ;;  %v1762_v1 = vsel %vm5613_vm14, %v1753_v61, %v1761_v62  ;;  %v1763_v2 = vrot.slane %v1761_v62, 4  ;;  %v4064_v53 = vld [vmem:[#allocation30 + $0x88] sm:$0xff]   ;;  %v4065_v54 = vld [vmem:[#allocation30 + $0x40] sm:$0xff]   ;;  %v4067_v56 = vld [vmem:[#allocation30 + $0x90] sm:$0xff]  }
 0x4c9   : > { %1777 = vst [vmem:[#allocation5 + $0x10] sm:$0xf] %v1762_v1  ;;  %v1771_v3 = vor.u32 %v1770_v63, %v1767_v60  ;;  %v4066_v55 = vld [vmem:[#allocation30] sm:$0xff]   ;;  %3555 = vmatprep.subr.bf16.mxu1 %v4065_v54  ;;  %v4068_v57 = vld [vmem:[#allocation30 + $0x48] sm:$0xff]   ;;  %v4071_v60 = vld [vmem:[#allocation30 + $0x50] sm:$0xff]  }
 0x4ca   : > { %v4069_v58 = vld [vmem:[#allocation30 + $0x8] sm:$0xff]   ;;  %v4072_v61 = vld [vmem:[#allocation30 + $0x10] sm:$0xff]   ;;  %v4073_v62 = vld [vmem:[#allocation30 + $0xa0] sm:$0xff]  }
 0x4cb   : > { %v1772_v4 = vsel %vm5613_vm14, %v1763_v2, %v1771_v3  ;;  %v4074_v63 = vld [vmem:[#allocation30 + $0x58] sm:$0xff]   ;;  %v4076_v1 = vld [vmem:[#allocation30 + $0xa8] sm:$0xff]   ;;  %v4077_v2 = vld [vmem:[#allocation30 + $0x60] sm:$0xff]  }
 0x4cc   : > { %1778 = vst [vmem:[#allocation5 + $0x1c] sm:$0xf] %v1772_v4  ;;  %v4075_v0 = vld [vmem:[#allocation30 + $0x18] sm:$0xff]   ;;  %v4078_v3 = vld [vmem:[#allocation30 + $0x20] sm:$0xff]   ;;  %v4079_v4 = vld [vmem:[#allocation30 + $0xb0] sm:$0xff]  }
 0x4cd   : > { %v4046_v5 = vld [vmem:[#allocation5 + $0x8] ss:$12 sps:$4 sm:$0xff]  }
 0x4ce   : > { %3656 = vmatprep.mubr.bf16.mxu1 %v4046_v5  ;;  %v4080_v5 = vld [vmem:[#allocation30 + $0x68] sm:$0xff]  }
 0x4cf   : > { %v4049_v6 = vld [vmem:[#allocation5 + $0x20] ss:$0 sps:$4 sm:$0xff]  }
 0x4d0   : > { %v4052_v8 = vld [vmem:[#allocation5 + $0x4] ss:$12 sps:$4 sm:$0xff]   ;;  %3657 = vmatmul.mubr.bf16.vlgmr.msra.gmra.mrb[12].mxu1 %v4049_v6 }
 0x4d1   : > { %2063 = vmatprep.mubr.bf16.mxu0 %v4052_v8  ;;  %3556 = vmatpush3.bf16.msra.mxu1 %v4066_v55  ;;  %v4081_v6 = vld [vmem:[#allocation30 + $0x28] sm:$0xff]   ;;  %v4083_v8 = vld [vmem:[#allocation30 + $0x70] sm:$0xff]  }
 0x4d2   : > { %2064 = vmatmul.mubr.bf16.vlgmr.msra.gmra.mrb[8].mxu0 %v4050_v7  ;;  %3557 = vmatprep.subr.bf16.mxu1 %v4068_v57  ;;  %v4082_v7 = vld [vmem:[#allocation30 + $0xb8] sm:$0xff]  }
 0x4d3   : > { %v1810_v10 = vld [vmem:[#allocation5 + $0x18] sm:$0xff]  ;;  %3661 = vmatpush3.bf16.msra.mxu0 %v5604_v46  ;;  %v4062_v46 = vld [vmem:[#allocation26 + $0x38] sm:$0xff]  }
 0x4d4   : > { %v3347_v11 = vcombine.high %v1810_v10, %v1810_v10  ;;  %3662 = vmatprep.subr.bf16.mxu0 %v4056_v9  ;;  %v3346_v12 = vcombine.low %v1810_v10, %v1810_v10  ;;  %v4086_v10 = vld [vmem:[#allocation30 + $0x78] sm:$0xff]  }
 0x4d5   : > { %3558 = vmatpush3.bf16.msra.mxu1 %v4069_v58 }
 0x4d6   : > { %2071 = vmatprep.mubr.bf16.mxu0 %v3347_v11  ;;  %3559 = vmatprep.subr.bf16.mxu1 %v4071_v60  ;;  %v4087_v11 = vld [vmem:[#allocation30 + $0x38] sm:$0xff]  }
 0x4d7   : > { %3663 = vmatpush3.bf16.msra.mxu0 %v4056_v9  ;;  %v4084_v9 = vld [vmem:[#allocation30 + $0x30] sm:$0xff]  }
 0x4d8   : > { %3664 = vmatprep.subr.bf16.mxu0 %v4057_v13 }
 0x4d9   : > { %3560 = vmatpush3.bf16.msra.mxu1 %v4072_v61 }
 0x4da   : > { %2072 = vmatmul.mubr.bf16.gmra.mrb[12].mxu0 %v3346_v12  ;;  %3561 = vmatprep.subr.bf16.mxu1 %v4074_v63  ;;  %v3383_v12 = vld [vmem:[#allocation27] ss:$0 sm:$0xff] }
 0x4db   : > { %3665 = vmatpush3.bf16.msra.mxu0 %v4057_v13 }
 0x4dc   : > { %3666 = vmatprep.subr.bf16.mxu0 %v4058_v14 }
 0x4dd   : > { %3562 = vmatpush3.bf16.msra.mxu1 %v4075_v0 }
 0x4de   : > { %3563 = vmatprep.subr.bf16.mxu1 %v4077_v2 }
 0x4df   : > { %3667 = vmatpush3.bf16.msra.mxu0 %v4058_v14  ;;  %v3384_v14 = vld [vmem:[#allocation29] ss:$0 sm:$0xff] }
 0x4e0   : > { %3668 = vmatprep.subr.bf16.mxu0 %v4059_v15 }
 0x4e1   : > { %3564 = vmatpush3.bf16.msra.mxu1 %v4078_v3 }
 0x4e2   : > { %3565 = vmatprep.subr.bf16.mxu1 %v4080_v5 }
 0x4e3   : > { %3669 = vmatpush3.bf16.msra.mxu0 %v4059_v15 }
 0x4e4   : > { %3670 = vmatprep.subr.bf16.mxu0 %v4060_v16 }
 0x4e5   : > { %3566 = vmatpush3.bf16.msra.mxu1 %v4081_v6 }
 0x4e6   : > { %3567 = vmatprep.subr.bf16.mxu1 %v4083_v8 }
 0x4e7   : > { %3671 = vmatpush3.bf16.msra.mxu0 %v4060_v16 }
 0x4e8   : > { %3672 = vmatprep.subr.bf16.mxu0 %v4061_v17 }
 0x4e9   : > { %3568 = vmatpush3.bf16.msra.mxu1 %v4084_v9 }
 0x4ea   : > { %3569 = vmatprep.subr.bf16.mxu1 %v4086_v10 }
 0x4eb   : > { %3673 = vmatpush3.bf16.msra.mxu0 %v4061_v17 }
 0x4ec   : > { %3674 = vmatprep.subr.bf16.mxu0 %v4062_v46 }
 0x4ed   : > { %3570 = vmatpush3.bf16.msra.mxu1 %v4087_v11 }
 0x4ee   : > { %3700 = vmatprep.subr.bf16.mxu1 %v4849_v52 }
 0x4ef   : > { %3675 = vmatpush3.bf16.msra.mxu0 %v4062_v46 }
 0x4f0   : > { %3680 = vmatprep.subr.bf16.mxu0 %v4849_v52 }
 0x5a3   : > { %v3658_v18 = vpop.f32.mrb[12].mxu1 }
 0x5a4   : > { %v2113_v19 = vpop.f32.mrb[13].mxu1 }
 0x5a5   : > { %v3659_v20 = vpop.f32.mrb[14].mxu1  ;;  %v3523_v21 = vpop.f32.mrb[8].mxu0 }
 0x5a6   : > { %v2116_v22 = vpop.f32.mrb[15].mxu1  ;;  %v3524_v23 = vpop.f32.mrb[9].mxu0  ;;  %v2290_v20 = vld [vmem:[#allocation4 + $0xc] sm:$0x3] }
 0x5a7   : > { %v3525_v24 = vadd.f32 %v3524_v23, %v3523_v21  ;;  %v3526_v25 = vpop.f32.mrb[10].mxu0 }
 0x5a8   : > { %v3527_v27 = vpop.f32.mrb[11].mxu0 }
 0x5a9   : > { %v2114_v28 = vadd.f32 %v3525_v24, %v2113_v19  ;;  %v3528_v29 = vadd.f32 %v3527_v27, %v3526_v25  ;;  %v2287_v24 = vld [vmem:[#allocation4] sm:$0xe]  ;;  %v2294_v27 = vunpack.c.l.bf16 %v2290_v20 }
 0x5ab   : > { %v2134_v31 = vmul.f32 %v3373_v26, %v2114_v28  ;;  %v2117_v32 = vadd.f32 %v3528_v29, %v2116_v22  ;;  %v2291_v29 = vunpack.c.l.bf16 %v2287_v24  ;;  %v4091_v24 = vld [vmem:[#allocation35 + $0x8] sm:$0xff]  }
 0x5ad   : > { %v2135_v33 = vmul.f32 %v3373_v26, %v2117_v32  ;;  %v3529_v34 = vpop.f32.mrb[12].mxu0  ;;  %v2144_v35 = vadd.f32 %v3374_v30, %v2134_v31  ;;  %v2288_v32 = vld [vmem:[#allocation4 + $0x4] sm:$0xff]  }
 0x5ae   : > { %v3530_v36 = vpop.f32.mrb[13].mxu0 }
 0x5af   : > { %v3531_v37 = vadd.f32 %v3530_v36, %v3529_v34  ;;  %v3532_v38 = vpop.f32.mrb[14].mxu0  ;;  %v2145_v39 = vadd.f32 %v3374_v30, %v2135_v33  ;;  %v2147_v42 = vmax.f32 %v2144_v35, 0.0  ;;  %v2292_v36 = vunpack.c.l.bf16 %v2288_v32 }
 0x5b0   : > { %v3533_v40 = vpop.f32.mrb[15].mxu0 }
 0x5b1   : > { %v2122_v41 = vadd.f32 %v3658_v18, %v3531_v37  ;;  %v2148_v43 = vmax.f32 %v2145_v39, 0.0  ;;  %v2293_v37 = vunpack.c.h.bf16 %v2288_v32 }
 0x5b3   : > { %v2136_v44 = vmul.f32 %v3373_v26, %v2122_v41  ;;  %v2150_v45 = vpack.c.bf16 %v2148_v43, %v2147_v42 }
 0x5b5   : > { %v2146_v48 = vadd.f32 %v3374_v30, %v2136_v44  ;;  %3676 = vmatprep.mubr.bf16.mxu0 %v2150_v45 }
 0x5b7   : > { %v2149_v49 = vmax.f32 %v2146_v48, 0.0 }
 0x5b9   : > { %v2151_v50 = vpack.c.bf16 %v2149_v49, %v2149_v49 }
 0x5bb   : > { %3677 = vmatmul.mubr.bf16.vlgmr.msra.gmra.mrb[16].mxu0 %v2151_v50 }
 0x5bc   : > { %3681 = vmatpush3.bf16.msra.mxu0 %v4063_v51  ;;  %3696 = vmatprep.mubr.msk.bf16.mxu0 %vm4850_vm15, %v4849_v52 }
 0x5bd   : > { %3682 = vmatprep.subr.bf16.mxu0 %v4849_v52 }
 0x5c0   : > { %3683 = vmatpush3.bf16.msra.mxu0 %v4064_v53 }
 0x5c1   : > { %3684 = vmatprep.subr.bf16.mxu0 %v4849_v52 }
 0x5c4   : > { %3685 = vmatpush3.bf16.msra.mxu0 %v4067_v56 }
 0x5c5   : > { %3686 = vmatprep.subr.bf16.mxu0 %v4849_v52 }
 0x5c8   : > { %3687 = vmatpush3.bf16.msra.mxu0 %v4070_v59 }
 0x5c9   : > { %3688 = vmatprep.subr.bf16.mxu0 %v4849_v52 }
 0x5cc   : > { %3689 = vmatpush3.bf16.msra.mxu0 %v4073_v62 }
 0x5cd   : > { %3690 = vmatprep.subr.bf16.mxu0 %v4849_v52 }
 0x5d0   : > { %3691 = vmatpush3.bf16.msra.mxu0 %v4076_v1 }
 0x5d1   : > { %3692 = vmatprep.subr.bf16.mxu0 %v4849_v52 }
 0x5d4   : > { %3693 = vmatpush3.bf16.msra.mxu0 %v4079_v4 }
 0x5d5   : > { %3694 = vmatprep.subr.bf16.mxu0 %v4849_v52 }
 0x5d8   : > { %3695 = vmatpush3.bf16.msra.mxu0 %v4082_v7 }
 0x5d9   : > { %3720 = vmatprep.subr.bf16.mxu0 %v4849_v52 }
 0x68e   : > { %v3678_v13 = vpop.f32.mrb[16].mxu0 }
 0x68f   : > { %v2273_v15 = vmul.f32 %v3678_v13, %v3383_v12  ;;  %v2250_v16 = vpop.f32.mrb[17].mxu0 }
 0x690   : > { %v2271_v17 = vmul.f32 %v3383_v12, %v2250_v16  ;;  %v3679_v46 = vpop.f32.mrb[18].mxu0 }
 0x691   : > { %v2283_v18 = vadd.f32 %v3384_v14, %v2273_v15  ;;  %v2253_v19 = vpop.f32.mrb[19].mxu0 }
 0x692   : > { %v2281_v21 = vadd.f32 %v3384_v14, %v2271_v17  ;;  %v2272_v22 = vmul.f32 %v3383_v12, %v2253_v19 }
 0x693   : > { %v2286_v23 = vmax.f32 %v2283_v18, 0.0 }
 0x694   : > { %v2284_v25 = vmax.f32 %v2281_v21, 0.0  ;;  %v2282_v26 = vadd.f32 %v3384_v14, %v2272_v22 }
 0x695   : > { %v2302_v28 = vrot.slane %v2286_v23, 5  ;;  %v4090_v23 = vld [vmem:[#allocation35] sm:$0xff]  }
 0x696   : > { %v2299_v30 = vrot.slane %v2284_v25, 5  ;;  %v2285_v31 = vmax.f32 %v2282_v26, 0.0  ;;  %v4092_v25 = vld [vmem:[#allocation35 + $0x10] sm:$0xff]   ;;  %v4093_v26 = vld [vmem:[#allocation35 + $0x18] sm:$0xff]  }
 0x697   : > { %v2311_v33 = vadd.f32 %v2302_v28, %v2294_v27  ;;  %v4094_v27 = vld [vmem:[#allocation35 + $0x20] sm:$0xff]  }
 0x698   : > { %v2308_v34 = vadd.f32 %v2299_v30, %v2291_v29  ;;  %v2300_v35 = vrot.slane %v2285_v31, 5  ;;  %v4096_v29 = vld [vmem:[#allocation35 + $0x30] sm:$0xff]   ;;  %v4098_v31 = vld [vmem:[#allocation39] sm:$0xff]  }
 0x699   : > { %v3452_v38 = vpack.c.bf16 %v2311_v33, %v2311_v33 }
 0x69a   : > { %v3449_v39 = vpack.c.bf16 %v2308_v34, %v2308_v34  ;;  %v2301_v40 = vsel %vm1324_vm3, %v2299_v30, %v2300_v35  ;;  %v2303_v41 = vsel %vm1324_vm3, %v2300_v35, %v2302_v28  ;;  %v4095_v28 = vld [vmem:[#allocation35 + $0x28] sm:$0xff]   ;;  %v4097_v30 = vld [vmem:[#allocation35 + $0x38] sm:$0xff]  }
 0x69b   : > { %v2309_v42 = vadd.f32 %v2301_v40, %v2292_v36  ;;  %v2310_v43 = vadd.f32 %v2303_v41, %v2293_v37  ;;  %v2354_v50 = vshrl.u32 %v3452_v38, 16  ;;  %v2357_v51 = vshll.u32 %v3452_v38, 16  ;;  %v3417_v40 = vld [vmem:[#allocation32] ss:$0 sm:$0xff] }
 0x69c   : > { %v2325_v44 = vshrl.u32 %v3449_v39, 16  ;;  %v2328_v45 = vshll.u32 %v3449_v39, 16 }
 0x69d   : > { %v3450_v48 = vpack.c.bf16 %v2309_v42, %v2309_v42  ;;  %v3451_v49 = vpack.c.bf16 %v2310_v43, %v2310_v43  ;;  %v2356_v63 = vrot.slane %v2354_v50, 5  ;;  %v2359_v0 = vrot.slane %v2357_v51, 6  ;;  %v3418_v43 = vld [vmem:[#allocation33] ss:$0 sm:$0xff]  ;;  %v4099_v50 = vld [vmem:[#allocation39 + $0x8] sm:$0xff]   ;;  %v4100_v51 = vld [vmem:[#allocation39 + $0x10] sm:$0xff]  }
 0x69e   : > { %v2327_v53 = vrot.slane %v2325_v44, 5  ;;  %v2330_v54 = vrot.slane %v2328_v45, 6 }
 0x69f   : > { %v2334_v55 = vshrl.u32 %v3450_v48, 16  ;;  %v2337_v56 = vshll.u32 %v3450_v48, 16  ;;  %v2344_v57 = vshrl.u32 %v3451_v49, 16  ;;  %v2347_v59 = vshll.u32 %v3451_v49, 16 }
 0x6a0   : > { %v2331_v58 = vor.u32 %v2330_v54, %v2327_v53  ;;  %v2360_v7 = vor.u32 %v2359_v0, %v2356_v63  ;;  %v4101_v53 = vld [vmem:[#allocation39 + $0x18] sm:$0xff]   ;;  %v4102_v54 = vld [vmem:[#allocation39 + $0x20] sm:$0xff]  }
 0x6a1   : > { %v2336_v60 = vrot.slane %v2334_v55, 5  ;;  %v2339_v61 = vrot.slane %v2337_v56, 6  ;;  %v2346_v62 = vrot.slane %v2344_v57, 5  ;;  %v2349_v2 = vrot.slane %v2347_v59, 6  ;;  %v4103_v55 = vld [vmem:[#allocation39 + $0x28] sm:$0xff]   ;;  %v4104_v56 = vld [vmem:[#allocation39 + $0x30] sm:$0xff]  }
 0x6a2   : > { %v2332_v1 = vrot.slane %v2331_v58, 4  ;;  %v4105_v57 = vld [vmem:[#allocation39 + $0x38] sm:$0xff]  }
 0x6a3   : > { %v2340_v3 = vor.u32 %v2339_v61, %v2336_v60  ;;  %v2350_v4 = vor.u32 %v2349_v2, %v2346_v62  ;;  %v3427_v58 = vld [vmem:[#allocation36] ss:$0 sm:$0xff]  ;;  %v3428_v60 = vld [vmem:[#allocation38] ss:$0 sm:$0xff] }
 0x6a5   : > { %v2341_v5 = vsel %vm5613_vm14, %v2332_v1, %v2340_v3  ;;  %v2342_v6 = vrot.slane %v2340_v3, 4  ;;  %v2352_v8 = vrot.slane %v2350_v4, 4 }
 0x6a6   : > { %2365 = vst [vmem:[#allocation6] sm:$0xf] %v2341_v5 }
 0x6a7   : > { %v2351_v9 = vsel %vm5613_vm14, %v2342_v6, %v2350_v4  ;;  %v2361_v10 = vsel %vm5613_vm14, %v2352_v8, %v2360_v7 }
 0x6a8   : > { %2366 = vst [vmem:[#allocation6 + $0x4] sm:$0xf] %v2351_v9  ;;  %2367 = vst [vmem:[#allocation6 + $0x8] sm:$0xf] %v2361_v10 }
 0x6ad   : > { %v2368_v11 = vld [vmem:[#allocation6] sm:$0x7] }
 0x6ae   : > { %2369 = vst [vmem:[#allocation7] sm:$0x7] %v2368_v11 }
 0x6af   : > { %v2370_v12 = vld [vmem:[#allocation6 + $0x4] sm:$0xf]  ;;  %v2382_v13 = vld [vmem:[#allocation6 + $0x8] sm:$0xe] }
 0x6b0   : > { %v2372_v14 = vshrl.u32 %v2370_v12, 16  ;;  %v2375_v15 = vshll.u32 %v2370_v12, 16  ;;  %v3389_v16 = vrot.slane %v2382_v13, 9  ;;  %v2812_v2 = vld [vmem:[#allocation6 + $0x4] sm:$0xf] }
 0x6b1   : > { %v2813_v4 = vunpack.c.l.bf16 %v2812_v2 }
 0x6b2   : > { %v2374_v17 = vrot.slane %v2372_v14, 4  ;;  %v2377_v46 = vrot.slane %v2375_v15, 5  ;;  %2387 = vst [vmem:[#allocation7 + $0x8] sm:$0x7] %v3389_v16  ;;  %v3430_v14 = vld [vmem:[#allocation41] ss:$0 sm:$0xff] }
 0x6b4   : > { %v2378_v18 = vor.u32 %v2377_v46, %v2374_v17 }
 0x6b6   : > { %v2379_v19 = vrot.slane %v2378_v18, 4 }
 0x6b8   : > { %2381 = vst [vmem:[#allocation7 + $0x4] sm:$0x7] %v2379_v19 }
 0x6b9   : > { %v4085_v20 = vld [vmem:[#allocation7 + $0x8] ss:$0 sps:$4 sm:$0x77]  }
 0x6ba   : > { %3697 = vmatmul.mubr.bf16.vlgmr.msra.gmra.mrb[20].mxu0 %v4085_v20 }
 0x6bb   : > { %3736 = vmatprep.mubr.msk.bf16.mxu0 %vm4850_vm15, %v4849_v52  ;;  %3721 = vmatpush3.bf16.msra.mxu0 %v4098_v31 }
 0x6bc   : > { %3722 = vmatprep.subr.bf16.mxu0 %v4849_v52 }
 0x6bf   : > { %v2388_v47 = vld [vmem:[#allocation7] sm:$0x77]  ;;  %3723 = vmatpush3.bf16.msra.mxu0 %v4099_v50 }
 0x6c0   : > { %v3390_v21 = vcombine.low %v2388_v47, %v2388_v47  ;;  %v3391_v22 = vcombine.high %v2388_v47, %v2388_v47  ;;  %3724 = vmatprep.subr.bf16.mxu0 %v4849_v52 }
 0x6c2   : > { %2625 = vmatprep.mubr.bf16.mxu1 %v3391_v22 }
 0x6c3   : > { %2626 = vmatmul.mubr.bf16.vlgmr.msra.gmra.mrb[16].mxu1 %v3390_v21  ;;  %3725 = vmatpush3.bf16.msra.mxu0 %v4100_v51 }
 0x6c4   : > { %3701 = vmatpush3.bf16.msra.mxu1 %v4090_v23  ;;  %3716 = vmatprep.mubr.msk.bf16.mxu1 %vm4850_vm15, %v4849_v52 }
 0x6c5   : > { %3702 = vmatprep.subr.bf16.mxu1 %v4849_v52  ;;  %3726 = vmatprep.subr.bf16.mxu0 %v4849_v52 }
 0x6c7   : > { %3727 = vmatpush3.bf16.msra.mxu0 %v4101_v53 }
 0x6c8   : > { %3703 = vmatpush3.bf16.msra.mxu1 %v4091_v24  ;;  %3728 = vmatprep.subr.bf16.mxu0 %v4849_v52 }
 0x6c9   : > { %3704 = vmatprep.subr.bf16.mxu1 %v4849_v52 }
 0x6cb   : > { %3729 = vmatpush3.bf16.msra.mxu0 %v4102_v54 }
 0x6cc   : > { %3705 = vmatpush3.bf16.msra.mxu1 %v4092_v25  ;;  %3730 = vmatprep.subr.bf16.mxu0 %v4849_v52 }
 0x6cd   : > { %3706 = vmatprep.subr.bf16.mxu1 %v4849_v52 }
 0x6cf   : > { %3731 = vmatpush3.bf16.msra.mxu0 %v4103_v55 }
 0x6d0   : > { %3707 = vmatpush3.bf16.msra.mxu1 %v4093_v26  ;;  %3732 = vmatprep.subr.bf16.mxu0 %v4849_v52 }
 0x6d1   : > { %3708 = vmatprep.subr.bf16.mxu1 %v4849_v52 }
 0x6d3   : > { %3733 = vmatpush3.bf16.msra.mxu0 %v4104_v56 }
 0x6d4   : > { %3709 = vmatpush3.bf16.msra.mxu1 %v4094_v27  ;;  %3734 = vmatprep.subr.bf16.mxu0 %v4849_v52 }
 0x6d5   : > { %3710 = vmatprep.subr.bf16.mxu1 %v4849_v52 }
 0x6d7   : > { %3735 = vmatpush3.bf16.msra.mxu0 %v4105_v57 }
 0x6d8   : > { %3711 = vmatpush3.bf16.msra.mxu1 %v4095_v28 }
 0x6d9   : > { %3712 = vmatprep.subr.bf16.mxu1 %v4849_v52 }
 0x6dc   : > { %3713 = vmatpush3.bf16.msra.mxu1 %v4096_v29 }
 0x6dd   : > { %3714 = vmatprep.subr.bf16.mxu1 %v4849_v52 }
 0x6e0   : > { %3715 = vmatpush3.bf16.msra.mxu1 %v4097_v30 }
 0x78d   : > { %v2667_v32 = vpop.f32.mrb[20].mxu0 }
 0x78e   : > { %v3698_v33 = vpop.f32.mrb[21].mxu0 }
 0x78f   : > { %v2670_v34 = vpop.f32.mrb[22].mxu0 }
 0x790   : > { %v3699_v35 = vpop.f32.mrb[23].mxu0 }
 0x796   : > { %v3571_v36 = vpop.f32.mrb[16].mxu1 }
 0x797   : > { %v3572_v37 = vpop.f32.mrb[17].mxu1 }
 0x798   : > { %v3573_v38 = vadd.f32 %v3572_v37, %v3571_v36  ;;  %v3574_v39 = vpop.f32.mrb[18].mxu1 }
 0x799   : > { %v3575_v41 = vpop.f32.mrb[19].mxu1 }
 0x79a   : > { %v2668_v42 = vadd.f32 %v3573_v38, %v2667_v32 }
 0x79c   : > { %v2680_v44 = vmul.f32 %v3417_v40, %v2668_v42 }
 0x79e   : > { %v2688_v45 = vadd.f32 %v3418_v43, %v2680_v44 }
 0x7a0   : > { %v2689_v48 = vmax.f32 %v2688_v45, 0.0 }
 0x7a2   : > { %v2690_v49 = vpack.c.bf16 %v2689_v48, %v2689_v48 }
 0x7a4   : > { %3717 = vmatmul.mubr.bf16.vlgmr.msra.gmra.mrb[20].mxu1 %v2690_v49 }
 0x877   : > { %v2789_v59 = vpop.f32.mrb[20].mxu1 }
 0x878   : > { %v2802_v61 = vmul.f32 %v3427_v58, %v2789_v59  ;;  %v3718_v62 = vpop.f32.mrb[21].mxu1 }
 0x879   : > { %v2792_v63 = vpop.f32.mrb[22].mxu1 }
 0x87a   : > { %v2810_v0 = vadd.f32 %v3428_v60, %v2802_v61  ;;  %v3719_v1 = vpop.f32.mrb[23].mxu1 }
 0x87c   : > { %v2811_v3 = vmax.f32 %v2810_v0, 0.0 }
 0x87e   : > { %v2815_v5 = vrot.slane %v2811_v3, 7 }
 0x880   : > { %v2817_v6 = vadd.f32 %v2815_v5, %v2813_v4 }
 0x882   : > { %v3453_v7 = vpack.c.bf16 %v2817_v6, %v2817_v6 }
 0x884   : > { %v2823_v8 = vshrl.u32 %v3453_v7, 16  ;;  %v2826_v9 = vshll.u32 %v3453_v7, 16 }
 0x886   : > { %v2825_v52 = vrot.slane %v2823_v8, 4  ;;  %v2828_v10 = vrot.slane %v2826_v9, 5 }
 0x888   : > { %v2829_v11 = vor.u32 %v2828_v10, %v2825_v52 }
 0x88a   : > { %v2830_v12 = vrot.slane %v2829_v11, 4 }
 0x88c   : > { %2832 = vst [vmem:[#allocation8] sm:$0x7] %v2830_v12 }
 0x893   : > { %v2833_v13 = vld [vmem:[#allocation8] sm:$0x7] }
 0x894   : > { %3737 = vmatmul.mubr.bf16.vlgmr.msra.gmra.mrb[24].mxu0 %v2833_v13 }
 0x967   : > { %v2939_v15 = vpop.f32.mrb[24].mxu0 }
 0x968   : > { %v2940_v16 = vadd.f32 %v3430_v14, %v2939_v15  ;;  %v3738_v17 = vpop.f32.mrb[25].mxu0 }
 0x969   : > { %v2942_v46 = vpop.f32.mrb[26].mxu0 }
 0x96a   : > { %2945 = vst [vmem:[%s963_s25] sm:$0x3f] %v2940_v16  ;;  %v3739_v18 = vpop.f32.mrb[27].mxu0 }
 0x96b   : > { %4725 = shalt.err (!%p4722_p8)
}
 0x96c   : > { %s4726_s26 = scalar_lea.hbm %s5671_s29, 128  ;;  %s4730_s10 = scalar_lea.hbm %s5850_s11, 256 }
 0x96d   : > { %p4727_p2 = scmp.ne.s32.totalorder %s5671_s29, %s4726_s26  ;;  %p4731_p7 = scmp.lt.u32.totalorder %s5671_s29, %s5850_s11 }
 0x96e   : > { %p4732_p4 = scmp.lt.u32.totalorder %s4730_s10, %s4726_s26  ;;  %p4734_p11 = scmp.lt.u32.totalorder %s4726_s26, %s5671_s29 }
 0x96f   : > { %p4728_p9 = pnand %p4727_p2, %p5851_p3 }
 0x970   : > { %p4733_p1 = por %p4732_p4, %p4731_p7 }
 0x971   : > { %p4729_p5 = pneg %p4728_p9 }
 0x972   : > { %p4735_p6 = por %p4734_p11, %p4733_p1 }
 0x974   : > { %p4736_p0 = pnand %p4735_p6, %p4729_p5 }
 0x976   : > { %4739 = shalt.err (!%p4736_p0)
}
 0x977   : > { %3820 = dma.vmem_to_hbm [thread:$0]  (%p5851_p3), %s5673_s0, 128, %s5671_s29, %s2947_s30  }
 0x978 PF: > { %s5852_s7 = sld [smem:[#allocation56_spill]]  ;;  %s5853_s5 = sld [smem:[#allocation59_spill]] }
 0x979   : > { %p5854_p10 = scmp.ne.s32.totalorder %s5812_s1, 0 }
 0x97e   : > { %s2972_s25 = sand.u32 1, %s5852_s7   ;;  %p5855_p12 = scmp.ge.s32.totalorder %s5853_s5, 2 }
 0x97f   : > { %s2973_s9 = scalar_lea.sflag [#allocation11], %s2972_s25 }
 0x980   : > { %p3888_p13 = pnand %p5855_p12, %p5854_p10 }
 0x982   : > { %4805 = dma.done.wait (!%p3888_p13), %s2973_s9, 128  }
 0x983   : > { %4807 = vsyncadd (!%p3888_p13), %s2973_s9, 4294967168  ;;  %s5856_s2 = sld [smem:[#allocation57_spill]]  ;;  %s5857_s25 = sld [smem:[#allocation58_spill]] }
 0x984   : > { %p46_p8 = scmp.ge.s32.totalorder %s5384_s27, 4   ;;  %s5858_s26 = smov %s5396_s21 }
 0x986   :  { %48 = sbr.rel (!%p46_p8) target bundleno = 32 (0x20), region = 238 }
 0x98d   :  { %2978 = vsyncpa [#allocation10], 1 }
 0x98e   :  { %2980 = vsyncpa [#allocation10 + $0x1], 1 }
 0x98f   :  { %2981 = vsyncpa [#allocation13], 1 }
 0x990   :  { %2983 = vsyncpa [#allocation13 + $0x1], 1 }
 0x991   :  { %2984 = vsyncpa [#allocation16], 1 }
 0x992   :  { %2985 = vsyncpa [#allocation19], 1 }
 0x993   :  { %2986 = vsyncpa [#allocation22], 1 }
 0x994   :  { %2987 = vsyncpa [#allocation25], 1 }
 0x995   :  { %2988 = vsyncpa [#allocation28], 1 }
 0x996   :  { %2989 = vsyncpa [#allocation31], 1 }
 0x997   :  { %2990 = vsyncpa [#allocation34], 1 }
 0x998   :  { %2991 = vsyncpa [#allocation37], 1 }
 0x999   :  { %2992 = vsyncpa [#allocation40], 1 }
 0x99a   :  { %2993 = vsyncpa [#allocation11], 1 }
 0x99b   :  { %2995 = vsyncpa [#allocation11 + $0x1], 1 }

</bundles_post_ra>
